<compile_context>
chip_gen: v5e
topology: v5e:2x2
jax: 0.10.0
libtpu: 0.0.40
codegen_flags: <defaults>
</compile_context>

<pallas_src>
import functools

import jax
import jax.numpy as jnp
from jax.experimental import pallas as pl
from jax.experimental.pallas import tpu as pltpu

EMB_LEN = 32
CNN_OUT = 128
KERNEL_SIZES = (3, 5)
DENSE_SIZE = 256
NPAD = 128          # lane-dense padding of the n_labels axis


# ----------------------------------------------------------------------------
# Kernel 1: one grid step == one full CNN branch (all batch rows at once)
# ----------------------------------------------------------------------------
def _branch_kernel(*refs, bsz, seq_len, kernel_sizes):
    nks = len(kernel_sizes)
    xc_refs = refs[:nks]
    w1_ref, b1_ref, w2_ref, b2_ref, dw_ref, db_ref, o_ref = refs[nks:]
    cnn_out = w1_ref.shape[-1]

    feats = []
    off1 = 0
    off2 = 0
    for j, ks in enumerate(kernel_sizes):
        lout1 = seq_len - ks + 1                  # conv1 output length
        t = lout1 // 3                            # after MaxPool1d(3)
        lout2 = t - ks + 1                        # conv2 output length
        s1 = lout1 + (-lout1) % 8                 # sublane-aligned row counts
        s2 = lout2 + (-lout2) % 8

        # ---- conv1 + ReLU: ONE deep matmul (im2col hoisted to wrapper) -----
        xc = xc_refs[j][0]                                   # (B*s1, ks*E) bf16
        w1 = w1_ref[0, off1:off1 + ks * EMB_LEN, :]          # (ks*E, C)    bf16
        b1 = b1_ref[0, j:j + 1, :]                           # (1, C)       f32
        y = jnp.maximum(
            jnp.dot(xc, w1, preferred_element_type=jnp.float32) + b1, 0.0)
        y = y.reshape(bsz, s1, cnn_out)                      # s1 % 8 == 0 -> free

        # ---- MaxPool1d(3): vectorized over batch and windows ---------------
        pooled = y[:, :3 * t, :].reshape(bsz, t, 3, cnn_out).max(axis=2)  # (B,t,C)

        # ---- conv2 im2col: lane-axis concat at 128-lane multiples ----------
        col = jnp.concatenate(
            [pooled[:, k:k + lout2, :] for k in range(ks)], axis=-1)      # (B,lout2,ks*C)
        if s2 != lout2:                                      # zero-pad rows
            col = jnp.concatenate(
                [col, jnp.zeros((bsz, s2 - lout2, ks * cnn_out), col.dtype)],
                axis=1)
        col = col.reshape(bsz * s2, ks * cnn_out)            # aligned fold
        w2 = w2_ref[0, off2:off2 + ks * cnn_out, :]          # (ks*C, C)    bf16
        b2 = b2_ref[0, j:j + 1, :]                           # (1, C)       f32
        z = jnp.maximum(
            jnp.dot(col.astype(jnp.bfloat16), w2,
                    preferred_element_type=jnp.float32) + b2, 0.0)
        z = z.reshape(bsz, s2, cnn_out)

        # ---- global max over the valid (un-padded) length only -------------
        # padded rows equal relu(b2) >= 0, so they must stay out of the max.
        feats.append(jnp.max(z[:, :lout2, :], axis=1))       # (B, C)

        off1 += ks * EMB_LEN
        off2 += ks * cnn_out

    h = jnp.concatenate(feats, axis=-1)                      # (B, 2C) = (B, 256)
    out = jnp.dot(h.astype(jnp.bfloat16), dw_ref[0],
                  preferred_element_type=jnp.float32) + db_ref[0]
    o_ref[0] = jnp.maximum(out, 0.0)                         # (B, NPAD) lane-dense


def fused_branches(xcs, w1, b1, w2, b2, dw, db, *, bsz, seq_len):
    nb = w1.shape[0]
    kern = functools.partial(_branch_kernel, bsz=bsz, seq_len=seq_len,
                             kernel_sizes=KERNEL_SIZES)
    in_specs = (
        [pl.BlockSpec((1,) + xc.shape[1:], lambda i: (i, 0, 0)) for xc in xcs]
        + [pl.BlockSpec((1,) + a.shape[1:], lambda i: (i, 0, 0))
           for a in (w1, b1, w2, b2, dw, db)])
    return pl.pallas_call(
        kern,
        out_shape=jax.ShapeDtypeStruct((nb, bsz, NPAD), jnp.float32),
        grid=(nb,),
        in_specs=in_specs,
        out_specs=pl.BlockSpec((1, bsz, NPAD), lambda i: (i, 0, 0)),
        compiler_params=pltpu.CompilerParams(
            dimension_semantics=("parallel",)),
    )(*xcs, w1, b1, w2, b2, dw, db)


# ----------------------------------------------------------------------------
# Kernel 2: feature MLP + ensemble average + final linear (single call)
# ----------------------------------------------------------------------------
def _head_kernel(feats_ref, w1_ref, b1_ref, w2_ref, b2_ref, bo_ref,
                 fw_ref, fb_ref, o_ref, *, inv_n_out):
    f = jnp.dot(feats_ref[...].astype(jnp.bfloat16), w1_ref[...],
                preferred_element_type=jnp.float32) + b1_ref[...]
    f = jnp.maximum(f, 0.0)                        # dropout == identity
    f = jnp.dot(f.astype(jnp.bfloat16), w2_ref[...],
                preferred_element_type=jnp.float32) + b2_ref[...]
    f = jnp.maximum(f, 0.0)
    # ensemble sum over branches (one VPU reduction) + average
    s = (f + jnp.sum(bo_ref[...], axis=0)) * inv_n_out      # (B, NPAD)
    o_ref[...] = jnp.dot(s.astype(jnp.bfloat16), fw_ref[...],
                         preferred_element_type=jnp.float32) + fb_ref[...]


def ensemble_head(feats, branch_out, p, inv_n_out):
    bsz = feats.shape[0]
    return pl.pallas_call(
        functools.partial(_head_kernel, inv_n_out=inv_n_out),
        out_shape=jax.ShapeDtypeStruct((bsz, NPAD), jnp.float32),
        in_specs=[pl.BlockSpec(memory_space=pltpu.MemorySpace.VMEM)] * 8,
        out_specs=pl.BlockSpec(memory_space=pltpu.MemorySpace.VMEM),
    )(feats, p["feat_w1"], p["feat_b1"], p["feat_w2"], p["feat_b2"],
      branch_out, p["final_w"], p["final_b"])


# ----------------------------------------------------------------------------
# Parameter setup / packing (plain JAX, done once outside the jitted forward)
# ----------------------------------------------------------------------------
def _dense_init(key, din, dout):
    k1, k2 = jax.random.split(key)
    scale = 1.0 / jnp.sqrt(jnp.float32(din))
    w = jax.random.uniform(k1, (din, dout), jnp.float32, -scale, scale)
    b = jax.random.uniform(k2, (dout,), jnp.float32, -scale, scale)
    return w, b


def _conv_init(key, k, cin, cout):
    k1, k2 = jax.random.split(key)
    scale = 1.0 / jnp.sqrt(jnp.float32(cin * k))
    w = jax.random.uniform(k1, (k, cin, cout), jnp.float32, -scale, scale)
    b = jax.random.uniform(k2, (cout,), jnp.float32, -scale, scale)
    return w, b


def init_params(key, n_labels, feat_dim, vocab_lens, branch_names):
    keys = jax.random.split(key, 3 + max(1, len(branch_names)))
    params = {}
    params["feat_w1"], params["feat_b1"] = _dense_init(keys[0], feat_dim, DENSE_SIZE)
    params["feat_w2"], params["feat_b2"] = _dense_init(keys[1], DENSE_SIZE, n_labels)
    params["final_w"], params["final_b"] = _dense_init(keys[2], n_labels, n_labels)
    for i, name in enumerate(branch_names):
        bkeys = jax.random.split(keys[3 + i], 2 + 2 * len(KERNEL_SIZES))
        branch = {"emb": 0.1 * jax.random.normal(
            bkeys[0], (vocab_lens[name], EMB_LEN), jnp.float32)}
        for j, ks in enumerate(KERNEL_SIZES):
            w1, b1 = _conv_init(bkeys[1 + 2 * j], ks, EMB_LEN, CNN_OUT)
            w2, b2 = _conv_init(bkeys[2 + 2 * j], ks, CNN_OUT, CNN_OUT)
            branch[f"conv{ks}"] = {"w1": w1, "b1": b1, "w2": w2, "b2": b2}
        branch["dense_w"], branch["dense_b"] = _dense_init(
            bkeys[-1], CNN_OUT * len(KERNEL_SIZES), n_labels)
        params[name] = branch
    return params


def pack_params(params, branch_names, n_labels):
    """One-time repack: stack branches, flatten conv taps (K*Cin, Cout),
    cast matmul weights to bf16, pad n_labels columns to NPAD (lane-dense)."""
    def padn(w):
        return jnp.pad(w, [(0, 0)] * (w.ndim - 1) + [(0, NPAD - w.shape[-1])])

    # TODO(synk): bf16 MXU operands diverge ~1e-2 rel. from the f32 PyTorch ref.
    packed = {
        "feat_w1": params["feat_w1"].astype(jnp.bfloat16),
        "feat_b1": params["feat_b1"].reshape(1, -1),
        "feat_w2": padn(params["feat_w2"]).astype(jnp.bfloat16),
        "feat_b2": padn(params["feat_b2"].reshape(1, -1)),
        "final_w": jnp.pad(params["final_w"],
                           ((0, NPAD - n_labels), (0, NPAD - n_labels))
                           ).astype(jnp.bfloat16),
        "final_b": padn(params["final_b"].reshape(1, -1)),
        "emb": {n: params[n]["emb"] for n in branch_names},
    }
    if branch_names:
        w1, b1, w2, b2, dw, db = [], [], [], [], [], []
        for name in branch_names:
            br = params[name]
            w1.append(jnp.concatenate(
                [br[f"conv{k}"]["w1"].reshape(k * EMB_LEN, CNN_OUT)
                 for k in KERNEL_SIZES], axis=0))
            b1.append(jnp.stack([br[f"conv{k}"]["b1"] for k in KERNEL_SIZES]))
            w2.append(jnp.concatenate(
                [br[f"conv{k}"]["w2"].reshape(k * CNN_OUT, CNN_OUT)
                 for k in KERNEL_SIZES], axis=0))
            b2.append(jnp.stack([br[f"conv{k}"]["b2"] for k in KERNEL_SIZES]))
            dw.append(padn(br["dense_w"]))
            db.append(padn(br["dense_b"].reshape(1, -1)))
        packed.update(
            w1=jnp.stack(w1).astype(jnp.bfloat16), b1=jnp.stack(b1),
            w2=jnp.stack(w2).astype(jnp.bfloat16), b2=jnp.stack(b2),
            dw=jnp.stack(dw).astype(jnp.bfloat16), db=jnp.stack(db))
    return packed


# ----------------------------------------------------------------------------
# Forward
# ----------------------------------------------------------------------------
def _im2col_conv1(xs, ks):
    """Plain-XLA conv1 im2col, batch folded into sublane-aligned rows.
    (nb, B, L, E) -> (nb, B*s1, ks*E) bf16, rows padded with zeros to s1."""
    nb, bsz, seq_len, emb = xs.shape
    lout1 = seq_len - ks + 1
    s1 = lout1 + (-lout1) % 8
    cols = jnp.concatenate([xs[:, :, k:k + lout1, :] for k in range(ks)],
                           axis=-1)                              # (nb,B,lout1,ks*E)
    if s1 != lout1:
        cols = jnp.pad(cols, ((0, 0), (0, 0), (0, s1 - lout1), (0, 0)))
    return cols.reshape(nb, bsz * s1, ks * emb).astype(jnp.bfloat16)


def penta_forward(branch_names, n_labels, packed, encodings, feats):
    bsz = feats.shape[0]
    if branch_names:
        # nn.Embedding gather (data-dependent) kept in plain-JAX glue.
        xs = jnp.stack([jnp.take(packed["emb"][n], encodings[n], axis=0)
                        for n in branch_names], axis=0)          # (NB, B, L, E)
        seq_len = xs.shape[2]
        xcs = tuple(_im2col_conv1(xs, ks) for ks in KERNEL_SIZES)
        branch_out = fused_branches(xcs, packed["w1"], packed["b1"],
                                    packed["w2"], packed["b2"],
                                    packed["dw"], packed["db"],
                                    bsz=bsz, seq_len=seq_len)
        n_out = len(branch_names) + 1
    else:
        branch_out = jnp.zeros((1, bsz, NPAD), jnp.float32)
        n_out = 1
    out = ensemble_head(feats, branch_out, packed, 1.0 / n_out)  # (B, NPAD)
    return out[:, :n_labels]


# ----------------------------------------------------------------------------
if __name__ == "__main__":
    B = 2
    L = 32          # sequence length (the k=5 conv stack needs (L-4)//3 >= 5)
    N_LABELS = 5
    FEAT_DIM = 10
    # TODO(synk): FAKE branch disabled — reference forward uses undefined self.dense_FAKE1.
    nn_flags = {"FAKE": False, "SQ": True, "DVMA": True,
                "DVSA": False, "DVEX": False, "DVL2": False}
    vocab_lens = {"SQ": 50, "DVMA": 60}
    branch_names = tuple(n for n in ("FAKE", "SQ", "DVMA", "DVSA", "DVEX", "DVL2")
                         if nn_flags[n])

    root = jax.random.PRNGKey(0)
    k_params, k_feat, k_sq, k_dv = jax.random.split(root, 4)
    params = init_params(k_params, N_LABELS, FEAT_DIM, vocab_lens, branch_names)
    packed = pack_params(params, branch_names, N_LABELS)

    feats = jax.random.normal(k_feat, (B, FEAT_DIM), jnp.float32)
    encodings = {
        "SQ": jax.random.randint(k_sq, (B, L), 0, vocab_lens["SQ"], jnp.int32),
        "DVMA": jax.random.randint(k_dv, (B, L), 0, vocab_lens["DVMA"], jnp.int32),
    }

    fwd = jax.jit(functools.partial(penta_forward, branch_names, N_LABELS))
    out = fwd(packed, encodings, feats)
    jax.block_until_ready(out)
    assert out.shape == (B, N_LABELS) and out.dtype == jnp.float32
    print("KERNEL_OK")
</pallas_src>

<mosaic_0001>
module attributes {stable_mosaic.version = 11 : i64} {
  func.func @_head_kernel(%arg0: memref<2x10xf32, #tpu.memory_space<vmem>>, %arg1: memref<10x256xbf16, #tpu.memory_space<vmem>>, %arg2: memref<1x256xf32, #tpu.memory_space<vmem>>, %arg3: memref<256x128xbf16, #tpu.memory_space<vmem>>, %arg4: memref<1x128xf32, #tpu.memory_space<vmem>>, %arg5: memref<2x2x128xf32, #tpu.memory_space<vmem>>, %arg6: memref<128x128xbf16, #tpu.memory_space<vmem>>, %arg7: memref<1x128xf32, #tpu.memory_space<vmem>>, %arg8: memref<2x128xf32, #tpu.memory_space<vmem>>) attributes {dimension_semantics = [], scalar_prefetch = 0 : i64, scratch_operands = 0 : i64, tpu.core_type = #tpu.core_type<tc>} {
    %c0 = arith.constant 0 : index
    %c0_0 = arith.constant 0 : index
    %0 = vector.load %arg0[%c0, %c0_0] : memref<2x10xf32, #tpu.memory_space<vmem>>, vector<2x10xf32>
    %1 = arith.truncf %0 : vector<2x10xf32> to vector<2x10xbf16>
    %c0_1 = arith.constant 0 : index
    %c0_2 = arith.constant 0 : index
    %2 = vector.load %arg1[%c0_1, %c0_2] : memref<10x256xbf16, #tpu.memory_space<vmem>>, vector<10x256xbf16>
    %cst = arith.constant dense<0.000000e+00> : vector<2x256xf32>
    %3 = tpu.matmul %1, %2, %cst {dimension_numbers = #tpu.dot_dimension_numbers<[1], [0], [0], [1], [0, 0, 1, 1], [], []>} : vector<2x10xbf16>, vector<10x256xbf16>, vector<2x256xf32> -> vector<2x256xf32>
    %c0_3 = arith.constant 0 : index
    %c0_4 = arith.constant 0 : index
    %4 = vector.load %arg2[%c0_3, %c0_4] : memref<1x256xf32, #tpu.memory_space<vmem>>, vector<1x256xf32>
    %5 = vector.broadcast %4 : vector<1x256xf32> to vector<2x256xf32>
    %6 = arith.addf %3, %5 : vector<2x256xf32>
    %cst_5 = arith.constant 0.000000e+00 : f32
    %7 = vector.broadcast %cst_5 : f32 to vector<2x256xf32>
    %8 = arith.maximumf %6, %7 : vector<2x256xf32>
    %9 = arith.truncf %8 : vector<2x256xf32> to vector<2x256xbf16>
    %c0_6 = arith.constant 0 : index
    %c0_7 = arith.constant 0 : index
    %10 = vector.load %arg3[%c0_6, %c0_7] : memref<256x128xbf16, #tpu.memory_space<vmem>>, vector<256x128xbf16>
    %cst_8 = arith.constant dense<0.000000e+00> : vector<2x128xf32>
    %11 = tpu.matmul %9, %10, %cst_8 {dimension_numbers = #tpu.dot_dimension_numbers<[1], [0], [0], [1], [0, 0, 1, 1], [], []>} : vector<2x256xbf16>, vector<256x128xbf16>, vector<2x128xf32> -> vector<2x128xf32>
    %c0_9 = arith.constant 0 : index
    %c0_10 = arith.constant 0 : index
    %12 = vector.load %arg4[%c0_9, %c0_10] : memref<1x128xf32, #tpu.memory_space<vmem>>, vector<1x128xf32>
    %13 = vector.broadcast %12 : vector<1x128xf32> to vector<2x128xf32>
    %14 = arith.addf %11, %13 : vector<2x128xf32>
    %cst_11 = arith.constant 0.000000e+00 : f32
    %15 = vector.broadcast %cst_11 : f32 to vector<2x128xf32>
    %16 = arith.maximumf %14, %15 : vector<2x128xf32>
    %c0_12 = arith.constant 0 : index
    %c0_13 = arith.constant 0 : index
    %c0_14 = arith.constant 0 : index
    %17 = vector.load %arg5[%c0_12, %c0_13, %c0_14] : memref<2x2x128xf32, #tpu.memory_space<vmem>>, vector<2x2x128xf32>
    %cst_15 = arith.constant dense<0.000000e+00> : vector<2x128xf32>
    %18 = vector.multi_reduction <add>, %17, %cst_15 [0] : vector<2x2x128xf32> to vector<2x128xf32>
    %19 = arith.addf %16, %18 : vector<2x128xf32>
    %cst_16 = arith.constant 0.333333343 : f32
    %20 = vector.broadcast %cst_16 : f32 to vector<2x128xf32>
    %21 = arith.mulf %19, %20 : vector<2x128xf32>
    %22 = arith.truncf %21 : vector<2x128xf32> to vector<2x128xbf16>
    %c0_17 = arith.constant 0 : index
    %c0_18 = arith.constant 0 : index
    %23 = vector.load %arg6[%c0_17, %c0_18] : memref<128x128xbf16, #tpu.memory_space<vmem>>, vector<128x128xbf16>
    %cst_19 = arith.constant dense<0.000000e+00> : vector<2x128xf32>
    %24 = tpu.matmul %22, %23, %cst_19 {dimension_numbers = #tpu.dot_dimension_numbers<[1], [0], [0], [1], [0, 0, 1, 1], [], []>} : vector<2x128xbf16>, vector<128x128xbf16>, vector<2x128xf32> -> vector<2x128xf32>
    %c0_20 = arith.constant 0 : index
    %c0_21 = arith.constant 0 : index
    %25 = vector.load %arg7[%c0_20, %c0_21] : memref<1x128xf32, #tpu.memory_space<vmem>>, vector<1x128xf32>
    %26 = vector.broadcast %25 : vector<1x128xf32> to vector<2x128xf32>
    %27 = arith.addf %24, %26 : vector<2x128xf32>
    %c0_22 = arith.constant 0 : index
    %c0_23 = arith.constant 0 : index
    %28 = vector.load %arg8[%c0_22, %c0_23] : memref<2x128xf32, #tpu.memory_space<vmem>>, vector<2x128xf32>
    tpu.vector_store %arg8[%c0_22, %c0_23], %27 {strides = array<i32>} : memref<2x128xf32, #tpu.memory_space<vmem>>, vector<2x128xf32>,
    return
  }
}

module attributes {stable_mosaic.version = 11 : i64} {
  func.func @_branch_kernel(%arg0: i32, %arg1: memref<1x64x96xbf16, #tpu.memory_space<vmem>>, %arg2: memref<1x64x160xbf16, #tpu.memory_space<vmem>>, %arg3: memref<1x256x128xbf16, #tpu.memory_space<vmem>>, %arg4: memref<1x2x128xf32, #tpu.memory_space<vmem>>, %arg5: memref<1x1024x128xbf16, #tpu.memory_space<vmem>>, %arg6: memref<1x2x128xf32, #tpu.memory_space<vmem>>, %arg7: memref<1x256x128xbf16, #tpu.memory_space<vmem>>, %arg8: memref<1x1x128xf32, #tpu.memory_space<vmem>>, %arg9: memref<1x2x128xf32, #tpu.memory_space<vmem>>) attributes {dimension_semantics = [#tpu.dimension_semantics<parallel>], iteration_bounds = array<i64: 2>, scalar_prefetch = 0 : i64, scratch_operands = 0 : i64, tpu.core_type = #tpu.core_type<tc>, window_params = [{transform_indices = @transform_0, window_bounds = array<i64: 1, 64, 96>}, {transform_indices = @transform_1, window_bounds = array<i64: 1, 64, 160>}, {transform_indices = @transform_2, window_bounds = array<i64: 1, 256, 128>}, {transform_indices = @transform_3, window_bounds = array<i64: 1, 2, 128>}, {transform_indices = @transform_4, window_bounds = array<i64: 1, 1024, 128>}, {transform_indices = @transform_5, window_bounds = array<i64: 1, 2, 128>}, {transform_indices = @transform_6, window_bounds = array<i64: 1, 256, 128>}, {transform_indices = @transform_7, window_bounds = array<i64: 1, 1, 128>}, {transform_indices = @transform_8, window_bounds = array<i64: 1, 2, 128>}]} {
    %c0 = arith.constant 0 : index
    %c0_0 = arith.constant 0 : index
    %c0_1 = arith.constant 0 : index
    %0 = vector.load %arg1[%c0, %c0_0, %c0_1] : memref<1x64x96xbf16, #tpu.memory_space<vmem>>, vector<1x64x96xbf16>
    %1 = vector.shape_cast %0 : vector<1x64x96xbf16> to vector<64x96xbf16>
    %c0_2 = arith.constant 0 : index
    %c0_3 = arith.constant 0 : index
    %c0_4 = arith.constant 0 : index
    %2 = vector.load %arg3[%c0_2, %c0_3, %c0_4] : memref<1x256x128xbf16, #tpu.memory_space<vmem>>, vector<1x96x128xbf16>
    %3 = vector.shape_cast %2 : vector<1x96x128xbf16> to vector<96x128xbf16>
    %c0_5 = arith.constant 0 : index
    %c0_6 = arith.constant 0 : index
    %c0_7 = arith.constant 0 : index
    %4 = vector.load %arg4[%c0_5, %c0_6, %c0_7] : memref<1x2x128xf32, #tpu.memory_space<vmem>>, vector<1x1x128xf32>
    %5 = vector.shape_cast %4 : vector<1x1x128xf32> to vector<1x128xf32>
    %cst = arith.constant dense<0.000000e+00> : vector<64x128xf32>
    %6 = tpu.matmul %1, %3, %cst {dimension_numbers = #tpu.dot_dimension_numbers<[1], [0], [0], [1], [0, 0, 1, 1], [], []>} : vector<64x96xbf16>, vector<96x128xbf16>, vector<64x128xf32> -> vector<64x128xf32>
    %7 = vector.broadcast %5 : vector<1x128xf32> to vector<64x128xf32>
    %8 = arith.addf %6, %7 : vector<64x128xf32>
    %cst_8 = arith.constant 0.000000e+00 : f32
    %9 = vector.broadcast %cst_8 : f32 to vector<64x128xf32>
    %10 = arith.maximumf %8, %9 : vector<64x128xf32>
    %11 = vector.shape_cast %10 : vector<64x128xf32> to vector<2x32x128xf32>
    %12 = vector.extract_strided_slice %11 {offsets = [0, 0, 0], sizes = [2, 30, 128], strides = [1, 1, 1]} : vector<2x32x128xf32> to vector<2x30x128xf32>
    %13 = vector.shape_cast %12 : vector<2x30x128xf32> to vector<2x10x3x128xf32>
    %cst_9 = arith.constant dense<0xFF800000> : vector<2x10x128xf32>
    %14 = vector.multi_reduction <maximumf>, %13, %cst_9 [2] : vector<2x10x3x128xf32> to vector<2x10x128xf32>
    %15 = vector.extract_strided_slice %14 {offsets = [0, 0, 0], sizes = [2, 8, 128], strides = [1, 1, 1]} : vector<2x10x128xf32> to vector<2x8x128xf32>
    %16 = vector.extract_strided_slice %14 {offsets = [0, 1, 0], sizes = [2, 8, 128], strides = [1, 1, 1]} : vector<2x10x128xf32> to vector<2x8x128xf32>
    %17 = vector.extract_strided_slice %14 {offsets = [0, 2, 0], sizes = [2, 8, 128], strides = [1, 1, 1]} : vector<2x10x128xf32> to vector<2x8x128xf32>
    %18 = tpu.concatenate %15, %16, %17 in 2 : vector<2x8x128xf32>, vector<2x8x128xf32>, vector<2x8x128xf32> -> vector<2x8x384xf32>
    %19 = vector.shape_cast %18 : vector<2x8x384xf32> to vector<16x384xf32>
    %c0_10 = arith.constant 0 : index
    %c0_11 = arith.constant 0 : index
    %c0_12 = arith.constant 0 : index
    %20 = vector.load %arg5[%c0_10, %c0_11, %c0_12] : memref<1x1024x128xbf16, #tpu.memory_space<vmem>>, vector<1x384x128xbf16>
    %21 = vector.shape_cast %20 : vector<1x384x128xbf16> to vector<384x128xbf16>
    %c0_13 = arith.constant 0 : index
    %c0_14 = arith.constant 0 : index
    %c0_15 = arith.constant 0 : index
    %22 = vector.load %arg6[%c0_13, %c0_14, %c0_15] : memref<1x2x128xf32, #tpu.memory_space<vmem>>, vector<1x1x128xf32>
    %23 = vector.shape_cast %22 : vector<1x1x128xf32> to vector<1x128xf32>
    %24 = arith.truncf %19 : vector<16x384xf32> to vector<16x384xbf16>
    %cst_16 = arith.constant dense<0.000000e+00> : vector<16x128xf32>
    %25 = tpu.matmul %24, %21, %cst_16 {dimension_numbers = #tpu.dot_dimension_numbers<[1], [0], [0], [1], [0, 0, 1, 1], [], []>} : vector<16x384xbf16>, vector<384x128xbf16>, vector<16x128xf32> -> vector<16x128xf32>
    %26 = vector.broadcast %23 : vector<1x128xf32> to vector<16x128xf32>
    %27 = arith.addf %25, %26 : vector<16x128xf32>
    %cst_17 = arith.constant 0.000000e+00 : f32
    %28 = vector.broadcast %cst_17 : f32 to vector<16x128xf32>
    %29 = arith.maximumf %27, %28 : vector<16x128xf32>
    %30 = vector.shape_cast %29 : vector<16x128xf32> to vector<2x8x128xf32>
    %cst_18 = arith.constant dense<0xFF800000> : vector<2x128xf32>
    %31 = vector.multi_reduction <maximumf>, %30, %cst_18 [1] : vector<2x8x128xf32> to vector<2x128xf32>
    %c0_19 = arith.constant 0 : index
    %c0_20 = arith.constant 0 : index
    %c0_21 = arith.constant 0 : index
    %32 = vector.load %arg2[%c0_19, %c0_20, %c0_21] : memref<1x64x160xbf16, #tpu.memory_space<vmem>>, vector<1x64x160xbf16>
    %33 = vector.shape_cast %32 : vector<1x64x160xbf16> to vector<64x160xbf16>
    %c0_22 = arith.constant 0 : index
    %c96 = arith.constant 96 : index
    %c0_23 = arith.constant 0 : index
    %34 = vector.load %arg3[%c0_22, %c96, %c0_23] : memref<1x256x128xbf16, #tpu.memory_space<vmem>>, vector<1x160x128xbf16>
    %35 = vector.shape_cast %34 : vector<1x160x128xbf16> to vector<160x128xbf16>
    %c0_24 = arith.constant 0 : index
    %c1 = arith.constant 1 : index
    %c0_25 = arith.constant 0 : index
    %36 = vector.load %arg4[%c0_24, %c1, %c0_25] : memref<1x2x128xf32, #tpu.memory_space<vmem>>, vector<1x1x128xf32>
    %37 = vector.shape_cast %36 : vector<1x1x128xf32> to vector<1x128xf32>
    %cst_26 = arith.constant dense<0.000000e+00> : vector<64x128xf32>
    %38 = tpu.matmul %33, %35, %cst_26 {dimension_numbers = #tpu.dot_dimension_numbers<[1], [0], [0], [1], [0, 0, 1, 1], [], []>} : vector<64x160xbf16>, vector<160x128xbf16>, vector<64x128xf32> -> vector<64x128xf32>
    %39 = vector.broadcast %37 : vector<1x128xf32> to vector<64x128xf32>
    %40 = arith.addf %38, %39 : vector<64x128xf32>
    %cst_27 = arith.constant 0.000000e+00 : f32
    %41 = vector.broadcast %cst_27 : f32 to vector<64x128xf32>
    %42 = arith.maximumf %40, %41 : vector<64x128xf32>
    %43 = vector.shape_cast %42 : vector<64x128xf32> to vector<2x32x128xf32>
    %44 = vector.extract_strided_slice %43 {offsets = [0, 0, 0], sizes = [2, 27, 128], strides = [1, 1, 1]} : vector<2x32x128xf32> to vector<2x27x128xf32>
    %45 = vector.shape_cast %44 : vector<2x27x128xf32> to vector<2x9x3x128xf32>
    %cst_28 = arith.constant dense<0xFF800000> : vector<2x9x128xf32>
    %46 = vector.multi_reduction <maximumf>, %45, %cst_28 [2] : vector<2x9x3x128xf32> to vector<2x9x128xf32>
    %47 = vector.extract_strided_slice %46 {offsets = [0, 0, 0], sizes = [2, 5, 128], strides = [1, 1, 1]} : vector<2x9x128xf32> to vector<2x5x128xf32>
    %48 = vector.extract_strided_slice %46 {offsets = [0, 1, 0], sizes = [2, 5, 128], strides = [1, 1, 1]} : vector<2x9x128xf32> to vector<2x5x128xf32>
    %49 = vector.extract_strided_slice %46 {offsets = [0, 2, 0], sizes = [2, 5, 128], strides = [1, 1, 1]} : vector<2x9x128xf32> to vector<2x5x128xf32>
    %50 = vector.extract_strided_slice %46 {offsets = [0, 3, 0], sizes = [2, 5, 128], strides = [1, 1, 1]} : vector<2x9x128xf32> to vector<2x5x128xf32>
    %51 = vector.extract_strided_slice %46 {offsets = [0, 4, 0], sizes = [2, 5, 128], strides = [1, 1, 1]} : vector<2x9x128xf32> to vector<2x5x128xf32>
    %52 = tpu.concatenate %47, %48, %49, %50, %51 in 2 : vector<2x5x128xf32>, vector<2x5x128xf32>, vector<2x5x128xf32>, vector<2x5x128xf32>, vector<2x5x128xf32> -> vector<2x5x640xf32>
    %cst_29 = arith.constant 0.000000e+00 : f32
    %53 = vector.broadcast %cst_29 : f32 to vector<2x3x640xf32>
    %54 = tpu.concatenate %52, %53 in 1 : vector<2x5x640xf32>, vector<2x3x640xf32> -> vector<2x8x640xf32>
    %55 = vector.shape_cast %54 : vector<2x8x640xf32> to vector<16x640xf32>
    %c0_30 = arith.constant 0 : index
    %c384 = arith.constant 384 : index
    %c0_31 = arith.constant 0 : index
    %56 = vector.load %arg5[%c0_30, %c384, %c0_31] : memref<1x1024x128xbf16, #tpu.memory_space<vmem>>, vector<1x640x128xbf16>
    %57 = vector.shape_cast %56 : vector<1x640x128xbf16> to vector<640x128xbf16>
    %c0_32 = arith.constant 0 : index
    %c1_33 = arith.constant 1 : index
    %c0_34 = arith.constant 0 : index
    %58 = vector.load %arg6[%c0_32, %c1_33, %c0_34] : memref<1x2x128xf32, #tpu.memory_space<vmem>>, vector<1x1x128xf32>
    %59 = vector.shape_cast %58 : vector<1x1x128xf32> to vector<1x128xf32>
    %60 = arith.truncf %55 : vector<16x640xf32> to vector<16x640xbf16>
    %cst_35 = arith.constant dense<0.000000e+00> : vector<16x128xf32>
    %61 = tpu.matmul %60, %57, %cst_35 {dimension_numbers = #tpu.dot_dimension_numbers<[1], [0], [0], [1], [0, 0, 1, 1], [], []>} : vector<16x640xbf16>, vector<640x128xbf16>, vector<16x128xf32> -> vector<16x128xf32>
    %62 = vector.broadcast %59 : vector<1x128xf32> to vector<16x128xf32>
    %63 = arith.addf %61, %62 : vector<16x128xf32>
    %cst_36 = arith.constant 0.000000e+00 : f32
    %64 = vector.broadcast %cst_36 : f32 to vector<16x128xf32>
    %65 = arith.maximumf %63, %64 : vector<16x128xf32>
    %66 = vector.shape_cast %65 : vector<16x128xf32> to vector<2x8x128xf32>
    %67 = vector.extract_strided_slice %66 {offsets = [0, 0, 0], sizes = [2, 5, 128], strides = [1, 1, 1]} : vector<2x8x128xf32> to vector<2x5x128xf32>
    %cst_37 = arith.constant dense<0xFF800000> : vector<2x128xf32>
    %68 = vector.multi_reduction <maximumf>, %67, %cst_37 [1] : vector<2x5x128xf32> to vector<2x128xf32>
    %69 = tpu.concatenate %31, %68 in 1 : vector<2x128xf32>, vector<2x128xf32> -> vector<2x256xf32>
    %70 = arith.truncf %69 : vector<2x256xf32> to vector<2x256xbf16>
    %c0_38 = arith.constant 0 : index
    %c0_39 = arith.constant 0 : index
    %c0_40 = arith.constant 0 : index
    %71 = vector.load %arg7[%c0_38, %c0_39, %c0_40] : memref<1x256x128xbf16, #tpu.memory_space<vmem>>, vector<1x256x128xbf16>
    %72 = vector.shape_cast %71 : vector<1x256x128xbf16> to vector<256x128xbf16>
    %cst_41 = arith.constant dense<0.000000e+00> : vector<2x128xf32>
    %73 = tpu.matmul %70, %72, %cst_41 {dimension_numbers = #tpu.dot_dimension_numbers<[1], [0], [0], [1], [0, 0, 1, 1], [], []>} : vector<2x256xbf16>, vector<256x128xbf16>, vector<2x128xf32> -> vector<2x128xf32>
    %c0_42 = arith.constant 0 : index
    %c0_43 = arith.constant 0 : index
    %c0_44 = arith.constant 0 : index
    %74 = vector.load %arg8[%c0_42, %c0_43, %c0_44] : memref<1x1x128xf32, #tpu.memory_space<vmem>>, vector<1x1x128xf32>
    %75 = vector.shape_cast %74 : vector<1x1x128xf32> to vector<1x128xf32>
    %76 = vector.broadcast %75 : vector<1x128xf32> to vector<2x128xf32>
    %77 = arith.addf %73, %76 : vector<2x128xf32>
    %cst_45 = arith.constant 0.000000e+00 : f32
    %78 = vector.broadcast %cst_45 : f32 to vector<2x128xf32>
    %79 = arith.maximumf %77, %78 : vector<2x128xf32>
    %c0_46 = arith.constant 0 : index
    %c0_47 = arith.constant 0 : index
    %c0_48 = arith.constant 0 : index
    %80 = vector.load %arg9[%c0_46, %c0_47, %c0_48] : memref<1x2x128xf32, #tpu.memory_space<vmem>>, vector<1x2x128xf32>
    %81 = vector.shape_cast %80 : vector<1x2x128xf32> to vector<2x128xf32>
    %82 = vector.shape_cast %79 : vector<2x128xf32> to vector<1x2x128xf32>
    tpu.vector_store %arg9[%c0_46, %c0_47, %c0_48], %82 {strides = array<i32>} : memref<1x2x128xf32, #tpu.memory_space<vmem>>, vector<1x2x128xf32>,
    return
  }
  func.func @transform_0(%arg0: i32) -> (i32, i32, i32) {
    %c0_i32 = arith.constant 0 : i32
    %c0_i32_0 = arith.constant 0 : i32
    %c0_i32_1 = arith.constant 0 : i32
    return %arg0, %c0_i32, %c0_i32_0 : i32, i32, i32
  }
  func.func @transform_1(%arg0: i32) -> (i32, i32, i32) {
    %c0_i32 = arith.constant 0 : i32
    %c0_i32_0 = arith.constant 0 : i32
    %c0_i32_1 = arith.constant 0 : i32
    return %arg0, %c0_i32, %c0_i32_0 : i32, i32, i32
  }
  func.func @transform_2(%arg0: i32) -> (i32, i32, i32) {
    %c0_i32 = arith.constant 0 : i32
    %c0_i32_0 = arith.constant 0 : i32
    %c0_i32_1 = arith.constant 0 : i32
    return %arg0, %c0_i32, %c0_i32_0 : i32, i32, i32
  }
  func.func @transform_3(%arg0: i32) -> (i32, i32, i32) {
    %c0_i32 = arith.constant 0 : i32
    %c0_i32_0 = arith.constant 0 : i32
    %c0_i32_1 = arith.constant 0 : i32
    return %arg0, %c0_i32, %c0_i32_0 : i32, i32, i32
  }
  func.func @transform_4(%arg0: i32) -> (i32, i32, i32) {
    %c0_i32 = arith.constant 0 : i32
    %c0_i32_0 = arith.constant 0 : i32
    %c0_i32_1 = arith.constant 0 : i32
    return %arg0, %c0_i32, %c0_i32_0 : i32, i32, i32
  }
  func.func @transform_5(%arg0: i32) -> (i32, i32, i32) {
    %c0_i32 = arith.constant 0 : i32
    %c0_i32_0 = arith.constant 0 : i32
    %c0_i32_1 = arith.constant 0 : i32
    return %arg0, %c0_i32, %c0_i32_0 : i32, i32, i32
  }
  func.func @transform_6(%arg0: i32) -> (i32, i32, i32) {
    %c0_i32 = arith.constant 0 : i32
    %c0_i32_0 = arith.constant 0 : i32
    %c0_i32_1 = arith.constant 0 : i32
    return %arg0, %c0_i32, %c0_i32_0 : i32, i32, i32
  }
  func.func @transform_7(%arg0: i32) -> (i32, i32, i32) {
    %c0_i32 = arith.constant 0 : i32
    %c0_i32_0 = arith.constant 0 : i32
    %c0_i32_1 = arith.constant 0 : i32
    return %arg0, %c0_i32, %c0_i32_0 : i32, i32, i32
  }
  func.func @transform_8(%arg0: i32) -> (i32, i32, i32) {
    %c0_i32 = arith.constant 0 : i32
    %c0_i32_0 = arith.constant 0 : i32
    %c0_i32_1 = arith.constant 0 : i32
    return %arg0, %c0_i32, %c0_i32_0 : i32, i32, i32
  }
}

</mosaic_0001>

<bundles_post_ra>
// kernel: penta_forward.3
= control target key start
LH: loop header
LB: loop body
LE: loop exit
PB: predicated region body
PF: predicated region fallthrough
CT: control target
= control target key end

     0   :  { %vm53_vm0 = vcmask 1044480   ;;  %vm49_vm1 = vcmask 80896   ;;  %s670_s0 = inlined_call_operand.vmem [shape: f32[2,10], index: 0, kind: input, shape index: {}]   ;;  %s671_s1 = inlined_call_operand.vmem [shape: bf16[10,256], index: 1, kind: input, shape index: {}]   ;;  %s672_s2 = inlined_call_operand.vmem [shape: f32[1,256], index: 2, kind: input, shape index: {}]   ;;  %s673_s3 = inlined_call_operand.vmem [shape: bf16[256,128], index: 3, kind: input, shape index: {}]   ;;  %s674_s4 = inlined_call_operand.vmem [shape: f32[1,128], index: 4, kind: input, shape index: {}]   ;;  %s675_s5 = inlined_call_operand.vmem [shape: f32[2,2,128], index: 5, kind: input, shape index: {}]   ;;  %s676_s6 = inlined_call_operand.vmem [shape: bf16[128,128], index: 6, kind: input, shape index: {}]   ;;  %s677_s7 = inlined_call_operand.vmem [shape: f32[1,128], index: 7, kind: input, shape index: {}]   ;;  %s678_s8 = inlined_call_operand.hbm [shape: f32[2,128], index: 8, kind: output, shape index: {}]  }
   0x1   :  { %v358_v0 = vld [vmem:[%s671_s1] sm:$0xf]  ;;  %v463_v1 = vld [vmem:[%s671_s1 + $0x4] sm:$0x10]  ;;  %v462_v4 = vld [vmem:[%s671_s1 + $0x4] sm:$0xf] }
   0x2   :  { %v359_v2 = vor.u32 %v463_v1, %v358_v0  ;;  %v31_v3 = vld [vmem:[%s670_s0] sm:$0x3]  ;;  %v360_v5 = vld [vmem:[%s671_s1 + $0x8] sm:$0x10]  ;;  %v471_v7 = vld [vmem:[%s673_s3 + $0x38] sm:$0xff] }
   0x3   :  { %v363_v6 = vor.u32 %v462_v4, %v360_v5  ;;  %v32_v9 = vpack.c.bf16 %v31_v3, %v31_v3  ;;  %v479_v10 = vld [vmem:[%s673_s3 + $0x78] sm:$0xff]  ;;  %222 = vmatpush.bf16.msra.mxu2 %v471_v7  ;;  %v470_v12 = vld [vmem:[%s673_s3 + $0x30] sm:$0xff] }
   0x4   :  { %v55_v8 = vsel %vm53_vm0, %v359_v2, 0  ;;  %235 = vmatpush.bf16.msra.mxu3 %v479_v10  ;;  %v478_v13 = vld [vmem:[%s673_s3 + $0x70] sm:$0xff] }
   0x5   :  { %67 = vmatpush.bf16.msra.mxu1 %v55_v8  ;;  %v58_v11 = vsel %vm53_vm0, %v363_v6, 0 }
   0x9   :  { %80 = vmatpush.bf16.msrb.mxu1 %v58_v11 }
   0xa   :  { %13 = vsyncpa [#allocation3], 0  ;;  %364 = vmatmul.msk.bf16.vlgmr.msra.gmra.mxu1 %vm49_vm1, %v32_v9  ;;  %223 = vmatpush.bf16.msra.mxu2 %v470_v12  ;;  %v469_v14 = vld [vmem:[%s673_s3 + $0x28] sm:$0xff]  ;;  %v468_v15 = vld [vmem:[%s673_s3 + $0x20] sm:$0xff]  ;;  %vm251_vm2 = vcmask 1041408   ;;  %s517_s1 = smov [#allocation2]  }
   0xb   :  { %236 = vmatpush.bf16.msra.mxu3 %v478_v13  ;;  %v467_v16 = vld [vmem:[%s673_s3 + $0x18] sm:$0xff]  ;;  %v466_v17 = vld [vmem:[%s673_s3 + $0x10] sm:$0xff]  ;;  %v465_v18 = vld [vmem:[%s673_s3 + $0x8] sm:$0xff]  ;;  %s345_s20 = sshll.u32 %s517_s1, 4  ;;  %s347_s22 = sshll.u32 %s678_s8, 4  ;;  %s346_s20 = int_to_ptr.vmem [resolvable:$true] %s345_s20  ;;  %s348_s22 = int_to_ptr.hbm [resolvable:$true] %s347_s22 }
   0xc   :  { %v477_v19 = vld [vmem:[%s673_s3 + $0x68] sm:$0xff]  ;;  %v464_v20 = vld [vmem:[%s673_s3] sm:$0xff]  ;;  %v475_v22 = vld [vmem:[%s673_s3 + $0x58] sm:$0xff] }
   0xd   :  { %v476_v21 = vld [vmem:[%s673_s3 + $0x60] sm:$0xff]  ;;  %v474_v23 = vld [vmem:[%s673_s3 + $0x50] sm:$0xff]  ;;  %v473_v24 = vld [vmem:[%s673_s3 + $0x48] sm:$0xff] }
   0xe   :  { %224 = vmatpush.bf16.msra.mxu2 %v469_v14  ;;  %v472_v25 = vld [vmem:[%s673_s3 + $0x40] sm:$0xff]  ;;  %v487_v26 = vld [vmem:[%s676_s6 + $0x38] sm:$0xff]  ;;  %v486_v40 = vld [vmem:[%s676_s6 + $0x30] sm:$0xff] }
   0xf   :  { %237 = vmatpush.bf16.msra.mxu3 %v477_v19  ;;  %v35_v27 = vld [vmem:[%s672_s2] sm:$0x3]  ;;  %326 = vmatpush.bf16.msra.mxu0 %v487_v26  ;;  %v485_v41 = vld [vmem:[%s676_s6 + $0x28] sm:$0xff]  ;;  %v483_v43 = vld [vmem:[%s676_s6 + $0x18] sm:$0xff] }
  0x10   :  { %v37_v28 = vperm.slane %v35_v27, 0  ;;  %v38_v34 = vperm.slane %v35_v27, 1  ;;  %v484_v42 = vld [vmem:[%s676_s6 + $0x20] sm:$0xff]  ;;  %v482_v44 = vld [vmem:[%s676_s6 + $0x10] sm:$0xff]  ;;  %v481_v45 = vld [vmem:[%s676_s6 + $0x8] sm:$0xff] }
  0x11   :  { %v480_v46 = vld [vmem:[%s676_s6] sm:$0xff] }
  0x12   :  { %225 = vmatpush.bf16.msra.mxu2 %v468_v15  ;;  %v489_v49 = vld [vmem:[%s674_s4] ss:$0 sm:$0xff]  ;;  %v250_v51 = vld [vmem:[%s675_s5 + $0x2] sm:$0x3] }
  0x13   :  { %238 = vmatpush.bf16.msra.mxu3 %v476_v21  ;;  %327 = vmatpush.bf16.msra.mxu0 %v486_v40  ;;  %v249_v50 = vld [vmem:[%s675_s5] sm:$0x3]  ;;  %v253_v53 = vsel %vm251_vm2, %v250_v51, 0.0 }
  0x14   :  { %v252_v52 = vsel %vm251_vm2, %v249_v50, 0.0  ;;  %v490_v63 = vld [vmem:[%s677_s7] ss:$0 sm:$0xff] }
  0x15   :  { %v254_v57 = vadd.f32 %v253_v53, %v252_v52 }
  0x16   :  { %226 = vmatpush.bf16.msra.mxu2 %v467_v16 }
  0x17   :  { %239 = vmatpush.bf16.msra.mxu3 %v475_v22  ;;  %328 = vmatpush.bf16.msra.mxu0 %v485_v41 }
  0x1a   :  { %365 = vmatmul.msk.bf16.vlgmr.msrb.gmra.mxu1 %vm49_vm1, %v32_v9  ;;  %227 = vmatpush.bf16.msra.mxu2 %v466_v17 }
  0x1b   :  { %240 = vmatpush.bf16.msra.mxu3 %v474_v23  ;;  %329 = vmatpush.bf16.msra.mxu0 %v484_v42 }
  0x1e   :  { %228 = vmatpush.bf16.msra.mxu2 %v465_v18 }
  0x1f   :  { %241 = vmatpush.bf16.msra.mxu3 %v473_v24  ;;  %330 = vmatpush.bf16.msra.mxu0 %v483_v43 }
  0x22   :  { %229 = vmatpush.bf16.msra.mxu2 %v464_v20 }
  0x23   :  { %242 = vmatpush.bf16.msra.mxu3 %v472_v25  ;;  %331 = vmatpush.bf16.msra.mxu0 %v482_v44 }
  0x27   :  { %332 = vmatpush.bf16.msra.mxu0 %v481_v45 }
  0x2b   :  { %333 = vmatpush.bf16.msra.mxu0 %v480_v46 }
  0x87   :  { %v69_v29 = vpop.f32.mrf.mxu1 }
  0x88   :  { %v70_v30 = vadd.f32 %v69_v29, %v37_v28 }
  0x8a   :  { %v86_v31 = vmax.f32 %v70_v30, 0.0 }
  0x8c   :  { %v88_v32 = vpack.c.bf16 %v86_v31, %v86_v31 }
  0x8e   :  { %230 = vmatmul.bf16.vlgmr.msra.gmra.mxu2 %v88_v32 }
  0x8f   :  { %v71_v33 = vpop.f32.mrf.mxu1 }
  0x97   :  { %v82_v35 = vpop.f32.mrf.mxu1 }
  0x98   :  { %v83_v36 = vadd.f32 %v82_v35, %v38_v34 }
  0x9a   :  { %v87_v37 = vmax.f32 %v83_v36, 0.0 }
  0x9c   :  { %v89_v38 = vpack.c.bf16 %v87_v37, %v87_v37 }
  0x9e   :  { %243 = vmatmul.bf16.vlgmr.msra.gmra.mxu3 %v89_v38 }
  0x9f   :  { %v84_v39 = vpop.f32.mrf.mxu1 }
 0x111   :  { %v231_v47 = vpop.f32.mrf.mxu2 }
 0x112   :  { %v232_v54 = vadd.f32 %v489_v49, %v231_v47 }
 0x119   :  { %v233_v48 = vpop.f32.mrf.mxu2 }
 0x121   :  { %v244_v55 = vpop.f32.mrf.mxu3 }
 0x122   :  { %v245_v56 = vadd.f32 %v244_v55, %v232_v54 }
 0x124   :  { %v248_v58 = vmax.f32 %v245_v56, 0.0 }
 0x126   :  { %v255_v59 = vadd.f32 %v254_v57, %v248_v58 }
 0x128   :  { %v256_v60 = vmul.f32 0.33333334, %v255_v59 }
 0x129   :  { %v246_v61 = vpop.f32.mrf.mxu3 }
 0x12a   :  { %v257_v62 = vpack.c.bf16 %v256_v60, %v256_v60 }
 0x12c   :  { %334 = vmatmul.bf16.vlgmr.msra.gmra.mxu0 %v257_v62 }
 0x1a9   :  { %v335_v0 = vpop.f32.mrf.mxu0 }
 0x1aa   :  { %v336_v1 = vadd.f32 %v490_v63, %v335_v0 }
 0x1ac   :  { %339 = vst [vmem:[#allocation2] sm:$0x3] %v336_v1 }
 0x1ad   :  { %350 = dma.vmem_to_hbm [thread:$0]  %s346_s20, 32, %s348_s22, [#allocation3]  }
 0x1b1   :  { %v337_v2 = vpop.f32.mrf.mxu0 }
 0x1b2   :  { %515 = dma.done.wait [#allocation3], 32  }
 0x1b3   :  { %516 = vsyncadd [#allocation3], 4294967264 }
 0x1b4   :  { %355 = vsyncpa [#allocation3], 1 }

// kernel: penta_forward.2
= control target key start
LH: loop header
LB: loop body
LE: loop exit
PB: predicated region body
PF: predicated region fallthrough
CT: control target
= control target key end

     0   :  { %s3119_s27 = smov 0   ;;  %s3705_s0 = inlined_call_operand.vmem [shape: bf16[2,64,96], index: 0, kind: input, shape index: {}]   ;;  %s3706_s1 = inlined_call_operand.vmem [shape: bf16[2,64,160], index: 1, kind: input, shape index: {}]   ;;  %s3707_s2 = inlined_call_operand.vmem [shape: bf16[2,256,128], index: 2, kind: input, shape index: {}]   ;;  %s3708_s3 = inlined_call_operand.vmem [shape: f32[2,2,128], index: 3, kind: input, shape index: {}]   ;;  %s3709_s4 = inlined_call_operand.vmem [shape: bf16[2,1024,128], index: 4, kind: input, shape index: {}]   ;;  %s3710_s5 = inlined_call_operand.vmem [shape: f32[2,2,128], index: 5, kind: input, shape index: {}]   ;;  %s3711_s6 = inlined_call_operand.vmem [shape: bf16[2,256,128], index: 6, kind: input, shape index: {}]   ;;  %s3712_s7 = inlined_call_operand.vmem [shape: f32[2,1,128], index: 7, kind: input, shape index: {}]   ;;  %s3713_s8 = inlined_call_operand.vmem [shape: f32[2,2,128], index: 8, kind: output, shape index: {}]  }
   0x1 LB: > { %s2465_s28 = sadd.s32 4294967295, %s3072_s27   ;;  %p2469_p0 = scmp.ge.s32.totalorder %s3072_s27, 1  ;;  %s3072_s27 = sphi %s3119_s27, %s18_s27  }
   0x2   : > { %p328_p1 = scmp.lt.s32.totalorder %s3072_s27, 3 }
   0x4   : > { %p329_p2 = pnand %p2469_p0, %p328_p1 }
   0x5   : > { %p392_p3 = scmp.lt.s32.totalorder (!%p329_p2), %s2465_s28, 1 }
   0x6   : > { %332 = sbr.rel (%p329_p2) target bundleno = 1018 (0x3fa), region = 52 }
   0xb   : > { %s3717_s28 = smov (!%p392_p3, %s2465_s28), 1  ;;  %vm511_vm0 = vcmask 785408   ;;  %vm723_vm1 = vcmask 1042432   ;;  %vm880_vm2 = vcmask 1041409   ;;  %vm882_vm3 = vcmask 1042434  }
   0xc   : > { %s2942_s29 = sshll.u32 %s3717_s28, 7  ;;  %s3139_s11 = sshll.u32 %s3717_s28, 1  ;;  %vm884_vm4 = vcmask 1043459   ;;  %vm886_vm5 = vcmask 1044484   ;;  %vm888_vm6 = vcmask 1045509   ;;  %vm890_vm7 = vcmask 1046534  }
   0xd   : > { %s3135_s10 = scalar_lea.vmem %s3707_s2, %s2942_s29  ;;  %s3146_s14 = scalar_lea.vmem %s3708_s3, %s3139_s11  ;;  %vm892_vm8 = vcmask 1047559   ;;  %vm1318_vm9 = vcmask 261120   ;;  %vm1737_vm10 = vcmask 1044480  }
   0xe   : > { %v2954_v0 = vld [vmem:[%s3135_s10 + $0x28] sm:$0xff]  ;;  %v2953_v1 = vld [vmem:[%s3135_s10 + $0x20] sm:$0xff]  ;;  %v2952_v2 = vld [vmem:[%s3135_s10 + $0x18] sm:$0xff]  ;;  %s2940_s15 = sshll.u32 %s3717_s28, 5  ;;  %s2943_s19 = sshll.u32 %s3717_s28, 9 }
   0xf   : > { %526 = vmatpush.bf16.msra.mxu0 %v2954_v0  ;;  %v2951_v3 = vld [vmem:[%s3135_s10 + $0x10] sm:$0xff]  ;;  %v2950_v4 = vld [vmem:[%s3135_s10 + $0x8] sm:$0xff]  ;;  %v2949_v5 = vld [vmem:[%s3135_s10] sm:$0xff]  ;;  %s396_s18 = scalar_lea.vmem %s3705_s0, %s2940_s15  ;;  %s3193_s22 = scalar_lea.vmem %s3709_s4, %s2943_s19 }
  0x10   : > { %v2945_v6 = vld [vmem:[%s396_s18] sm:$0xff]  ;;  %v2946_v7 = vld [vmem:[%s396_s18 + $0x8] sm:$0xff]  ;;  %v2947_v8 = vld [vmem:[%s396_s18 + $0x10] sm:$0xff]  ;;  %s3200_s25 = scalar_lea.vmem %s3710_s5, %s3139_s11  ;;  %s2941_s26 = sshll.u32 %s3717_s28, 6 }
  0x11   : > { %v2948_v9 = vld [vmem:[%s396_s18 + $0x18] sm:$0xff]  ;;  %v3157_v10 = vld [vmem:[%s3146_s14] ss:$0 sm:$0xff]  ;;  %s3435_s15 = scalar_lea.vmem %s3711_s6, %s2942_s29  ;;  %s427_s16 = scalar_lea.vmem %s3712_s7, %s3717_s28  ;;  %vm3589_vm11 = vmpackc.low %vm1737_vm10, %vm1737_vm10 }
  0x12   : > { %s431_s21 = scalar_lea.vmem %s3713_s8, %s3139_s11 }
  0x13   : > { %527 = vmatpush.bf16.msra.mxu0 %v2953_v1 }
  0x17   : > { %528 = vmatpush.bf16.msra.mxu0 %v2952_v2 }
  0x1b   : > { %529 = vmatpush.bf16.msra.mxu0 %v2951_v3 }
  0x1f   : > { %530 = vmatpush.bf16.msra.mxu0 %v2950_v4 }
  0x23   : > { %531 = vmatpush.bf16.msra.mxu0 %v2949_v5 }
  0x26   : > { %2523 = vmatmul.msk.bf16.vlgmr.msra.gmra.mxu0 %vm511_vm0, %v2945_v6 }
  0x36   : > { %2524 = vmatmul.msk.bf16.gmra.mxu0 %vm511_vm0, %v2946_v7 }
  0x46   : > { %2525 = vmatmul.msk.bf16.gmra.mxu0 %vm511_vm0, %v2947_v8 }
  0x56   : > { %2526 = vmatmul.msk.bf16.gmra.mxu0 %vm511_vm0, %v2948_v9 }
  0xa3   : > { %v533_v11 = vpop.f32.mrf.mxu0 }
  0xa4   : > { %v534_v12 = vadd.f32 %v3157_v10, %v533_v11  ;;  %v2962_v11 = vld [vmem:[%s3193_s22 + $0x38] sm:$0xff] }
  0xa5   : > { %1136 = vmatpush.bf16.msra.mxu1 %v2962_v11 }
  0xa6   : > { %v553_v13 = vmax.f32 %v534_v12, 0.0 }
  0xa8   : > { %v569_v14 = vrot.slane %v553_v13, 1  ;;  %v570_v15 = vrot.slane %v553_v13, 2  ;;  %621 = vst [vmem:[#allocation1] ss:$9 sm:$0xff] %v553_v13  ;;  %v571_v16 = vrot.slane %v553_v13, 3  ;;  %v572_v17 = vrot.slane %v553_v13, 4 }
  0xa9   : > { %v573_v19 = vrot.slane %v553_v13, 5  ;;  %v574_v22 = vrot.slane %v553_v13, 6  ;;  %v575_v23 = vrot.slane %v553_v13, 7 }
  0xaa   : > { %623 = vst [vmem:[#allocation1 + $0x1] ss:$9 sm:$0xff] %v569_v14 }
  0xab   : > { %625 = vst [vmem:[#allocation1 + $0x2] ss:$9 sm:$0xff] %v570_v15  ;;  %v535_v20 = vpop.f32.mrf.mxu0 }
  0xac   : > { %v536_v21 = vadd.f32 %v3157_v10, %v535_v20  ;;  %v2959_v20 = vld [vmem:[%s3193_s22 + $0x20] sm:$0xff] }
  0xae   : > { %v554_v25 = vmax.f32 %v536_v21, 0.0 }
  0xb0   : > { %v576_v26 = vrot.slane %v554_v25, 1  ;;  %v577_v27 = vrot.slane %v554_v25, 2  ;;  %v578_v29 = vrot.slane %v554_v25, 3  ;;  %v579_v30 = vrot.slane %v554_v25, 4 }
  0xb1   : > { %v580_v31 = vrot.slane %v554_v25, 5  ;;  %v581_v34 = vrot.slane %v554_v25, 6  ;;  %v582_v37 = vrot.slane %v554_v25, 7 }
  0xb2   : > { %v3160_v18 = vld [vmem:[#allocation1] sm:$0xff] }
  0xb3   : > { %627 = vst [vmem:[#allocation1] ss:$9 sm:$0xff] %v571_v16  ;;  %v538_v33 = vpop.f32.mrf.mxu0  ;;  %v2961_v16 = vld [vmem:[%s3193_s22 + $0x30] sm:$0xff]  ;;  %v724_v21 = vsel %vm723_vm1, %v3160_v18, -inf }
  0xb4   : > { %628 = vst [vmem:[#allocation1 + $0x1] ss:$9 sm:$0xff] %v572_v17  ;;  %v539_v35 = vadd.f32 %v3157_v10, %v538_v33  ;;  %1137 = vmatpush.bf16.msra.mxu1 %v2961_v16  ;;  %v2960_v17 = vld [vmem:[%s3193_s22 + $0x28] sm:$0xff]  ;;  %v2970_v33 = vld [vmem:[%s3193_s22 + $0x78] sm:$0xff] }
  0xb5   : > { %629 = vst [vmem:[#allocation1 + $0x2] ss:$9 sm:$0xff] %v573_v19  ;;  %1150 = vmatpush.bf16.msra.mxu2 %v2970_v33 }
  0xb6   : > { %v555_v36 = vmax.f32 %v539_v35, 0.0 }
  0xb8   : > { %v583_v38 = vrot.slane %v555_v36, 1  ;;  %v584_v40 = vrot.slane %v555_v36, 2  ;;  %v585_v41 = vrot.slane %v555_v36, 3  ;;  %v586_v43 = vrot.slane %v555_v36, 4  ;;  %1138 = vmatpush.bf16.msra.mxu1 %v2960_v17 }
  0xb9   : > { %v587_v44 = vrot.slane %v555_v36, 5  ;;  %v588_v46 = vrot.slane %v555_v36, 6  ;;  %v589_v48 = vrot.slane %v555_v36, 7 }
  0xbb   : > { %v540_v45 = vpop.f32.mrf.mxu0 }
  0xbc   : > { %v3163_v24 = vld [vmem:[#allocation1] sm:$0xff]  ;;  %v541_v49 = vadd.f32 %v3157_v10, %v540_v45  ;;  %1139 = vmatpush.bf16.msra.mxu1 %v2959_v20 }
  0xbd   : > { %631 = vst [vmem:[#allocation1] ss:$9 sm:$0xff] %v574_v22 }
  0xbe   : > { %632 = vst [vmem:[#allocation1 + $0x1] ss:$9 sm:$0xff] %v575_v23  ;;  %v556_v50 = vmax.f32 %v541_v49, 0.0  ;;  %v2968_v49 = vld [vmem:[%s3193_s22 + $0x68] sm:$0xff] }
  0xbf   : > { %633 = vst [vmem:[#allocation1 + $0x2] ss:$9 sm:$0xff] %v554_v25 }
  0xc0   : > { %v590_v52 = vrot.slane %v556_v50, 1  ;;  %v591_v53 = vrot.slane %v556_v50, 2  ;;  %v592_v54 = vrot.slane %v556_v50, 3  ;;  %v593_v56 = vrot.slane %v556_v50, 4 }
  0xc1   : > { %v594_v59 = vrot.slane %v556_v50, 5 }
  0xc3   : > { %v543_v55 = vpop.f32.mrf.mxu0 }
  0xc4   : > { %v544_v58 = vadd.f32 %v3157_v10, %v543_v55  ;;  %v2955_v55 = vld [vmem:[%s3193_s22] sm:$0xff] }
  0xc6   : > { %v3165_v28 = vld [vmem:[#allocation1] sm:$0xff]  ;;  %v557_v60 = vmax.f32 %v544_v58, 0.0 }
  0xc7   : > { %635 = vst [vmem:[#allocation1] ss:$9 sm:$0xff] %v576_v26  ;;  %v738_v18 = vsel %vm723_vm1, %v3165_v28, -inf  ;;  %v2967_v58 = vld [vmem:[%s3193_s22 + $0x60] sm:$0xff] }
  0xc8   : > { %636 = vst [vmem:[#allocation1 + $0x1] ss:$9 sm:$0xff] %v577_v27  ;;  %v595_v61 = vrot.slane %v557_v60, 1  ;;  %v596_v62 = vrot.slane %v557_v60, 2  ;;  %v597_v0 = vrot.slane %v557_v60, 3  ;;  %v598_v1 = vrot.slane %v557_v60, 4 }
  0xc9   : > { %637 = vst [vmem:[#allocation1 + $0x2] ss:$9 sm:$0xff] %v578_v29  ;;  %v599_v3 = vrot.slane %v557_v60, 5  ;;  %v600_v6 = vrot.slane %v557_v60, 6  ;;  %v601_v7 = vrot.slane %v557_v60, 7  ;;  %v725_v29 = vrot.slane %v724_v21, 4 }
  0xcb   : > { %v545_v4 = vpop.f32.mrf.mxu0  ;;  %v726_v35 = vmax.f32 %v724_v21, %v725_v29  ;;  %v2992_v29 = vld [vmem:[%s3135_s10 + $0x58] sm:$0xff] }
  0xcc   : > { %v546_v5 = vadd.f32 %v3157_v10, %v545_v4 }
  0xce   : > { %v558_v9 = vmax.f32 %v546_v5, 0.0 }
  0xd0   : > { %v3167_v32 = vld [vmem:[#allocation1] sm:$0xff]  ;;  %v602_v12 = vrot.slane %v558_v9, 1  ;;  %v603_v13 = vrot.slane %v558_v9, 2  ;;  %v604_v15 = vrot.slane %v558_v9, 3  ;;  %v605_v19 = vrot.slane %v558_v9, 4 }
  0xd1   : > { %639 = vst [vmem:[#allocation1] ss:$9 sm:$0xff] %v579_v30  ;;  %v606_v22 = vrot.slane %v558_v9, 5  ;;  %v607_v26 = vrot.slane %v558_v9, 6  ;;  %v2958_v30 = vld [vmem:[%s3193_s22 + $0x18] sm:$0xff] }
  0xd2   : > { %640 = vst [vmem:[#allocation1 + $0x1] ss:$9 sm:$0xff] %v580_v31  ;;  %v731_v31 = vsel %vm723_vm1, %v3163_v24, -inf  ;;  %1140 = vmatpush.bf16.msra.mxu1 %v2958_v30  ;;  %v745_v24 = vsel %vm723_vm1, %v3167_v32, -inf }
  0xd3   : > { %641 = vst [vmem:[#allocation1 + $0x2] ss:$9 sm:$0xff] %v581_v34  ;;  %v548_v25 = vpop.f32.mrf.mxu0 }
  0xd4   : > { %v549_v27 = vadd.f32 %v3157_v10, %v548_v25 }
  0xd6   : > { %v3218_v34 = vmax.f32 %v549_v27, 0.0  ;;  %v2975_v27 = vld [vmem:[%s3193_s22 + $0xa0] sm:$0xff] }
  0xd8   : > { %v611_v5 = vrot.slane %v3218_v34, 3 }
  0xda   : > { %v3170_v39 = vld [vmem:[#allocation1] sm:$0xff] }
  0xdb   : > { %643 = vst [vmem:[#allocation1] ss:$9 sm:$0xff] %v582_v37  ;;  %v2957_v37 = vld [vmem:[%s3193_s22 + $0x10] sm:$0xff] }
  0xdc   : > { %644 = vst [vmem:[#allocation1 + $0x1] ss:$9 sm:$0xff] %v555_v36  ;;  %v732_v36 = vrot.slane %v731_v31, 4  ;;  %1141 = vmatpush.bf16.msra.mxu1 %v2957_v37 }
  0xdd   : > { %645 = vst [vmem:[#allocation1 + $0x2] ss:$9 sm:$0xff] %v583_v38  ;;  %v739_v38 = vrot.slane %v738_v18, 4 }
  0xde   : > { %v733_v45 = vmax.f32 %v731_v31, %v732_v36 }
  0xe4   : > { %v3172_v42 = vld [vmem:[#allocation1] sm:$0xff] }
  0xe5   : > { %647 = vst [vmem:[#allocation1] ss:$9 sm:$0xff] %v584_v40  ;;  %v2969_v40 = vld [vmem:[%s3193_s22 + $0x70] sm:$0xff] }
  0xe6   : > { %648 = vst [vmem:[#allocation1 + $0x1] ss:$9 sm:$0xff] %v585_v41  ;;  %v608_v41 = vrot.slane %v558_v9, 7  ;;  %1151 = vmatpush.bf16.msra.mxu2 %v2969_v40 }
  0xe7   : > { %649 = vst [vmem:[#allocation1 + $0x2] ss:$9 sm:$0xff] %v586_v43  ;;  %v609_v43 = vrot.slane %v3218_v34, 1 }
  0xea   : > { %1152 = vmatpush.bf16.msra.mxu2 %v2968_v49  ;;  %v550_v49 = vpop.f32.mrf.mxu0 }
  0xee   : > { %v3174_v47 = vld [vmem:[#allocation1] sm:$0xff]  ;;  %1153 = vmatpush.bf16.msra.mxu2 %v2967_v58 }
  0xef   : > { %651 = vst [vmem:[#allocation1] ss:$9 sm:$0xff] %v587_v44  ;;  %v727_v44 = vrot.slane %v726_v35, 2 }
  0xf0   : > { %652 = vst [vmem:[#allocation1 + $0x1] ss:$9 sm:$0xff] %v588_v46  ;;  %v2956_v46 = vld [vmem:[%s3193_s22 + $0x8] sm:$0xff] }
  0xf1   : > { %653 = vst [vmem:[#allocation1 + $0x2] ss:$9 sm:$0xff] %v589_v48  ;;  %v740_v48 = vmax.f32 %v738_v18, %v739_v38  ;;  %1142 = vmatpush.bf16.msra.mxu1 %v2956_v46  ;;  %v728_v32 = vmax.f32 %v726_v35, %v727_v44  ;;  %v2964_v44 = vld [vmem:[%s3193_s22 + $0x48] sm:$0xff]  ;;  %v2991_v46 = vld [vmem:[%s3135_s10 + $0x50] sm:$0xff] }
  0xf5   : > { %1143 = vmatpush.bf16.msra.mxu1 %v2955_v55 }
  0xf8   : > { %v3177_v51 = vld [vmem:[#allocation1] sm:$0xff] }
  0xf9   : > { %655 = vst [vmem:[#allocation1] ss:$9 sm:$0xff] %v556_v50  ;;  %v2978_v50 = vld [vmem:[%s3193_s22 + $0xb8] sm:$0xff] }
  0xfa   : > { %656 = vst [vmem:[#allocation1 + $0x1] ss:$9 sm:$0xff] %v590_v52  ;;  %v746_v52 = vrot.slane %v745_v24, 4  ;;  %1164 = vmatpush.bf16.msra.mxu3 %v2978_v50 }
  0xfb   : > { %657 = vst [vmem:[#allocation1 + $0x2] ss:$9 sm:$0xff] %v591_v53  ;;  %v734_v53 = vrot.slane %v733_v45, 2 }
 0x102   : > { %v3179_v57 = vld [vmem:[#allocation1] sm:$0xff] }
 0x103   : > { %659 = vst [vmem:[#allocation1] ss:$9 sm:$0xff] %v592_v54  ;;  %v752_v54 = vsel %vm723_vm1, %v3170_v39, -inf  ;;  %v610_v39 = vrot.slane %v3218_v34, 2 }
 0x104   : > { %660 = vst [vmem:[#allocation1 + $0x1] ss:$9 sm:$0xff] %v593_v56  ;;  %v741_v56 = vrot.slane %v740_v48, 2 }
 0x105   : > { %661 = vst [vmem:[#allocation1 + $0x2] ss:$9 sm:$0xff] %v594_v59  ;;  %v2977_v59 = vld [vmem:[%s3193_s22 + $0xb0] sm:$0xff] }
 0x106   : > { %1165 = vmatpush.bf16.msra.mxu3 %v2977_v59  ;;  %v742_v4 = vmax.f32 %v740_v48, %v741_v56  ;;  %v613_v48 = vrot.slane %v3218_v34, 5  ;;  %v2963_v59 = vld [vmem:[%s3193_s22 + $0x40] sm:$0xff] }
 0x108   : > { %v743_v21 = vrot.slane %v742_v4, 1 }
 0x10c   : > { %v3182_v63 = vld [vmem:[#allocation1] sm:$0xff] }
 0x10d   : > { %663 = vst [vmem:[#allocation1] ss:$9 sm:$0xff] %v557_v60  ;;  %v2994_v60 = vld [vmem:[%s3135_s10 + $0x68] sm:$0xff] }
 0x10e   : > { %664 = vst [vmem:[#allocation1 + $0x1] ss:$9 sm:$0xff] %v595_v61  ;;  %v747_v61 = vmax.f32 %v745_v24, %v746_v52  ;;  %1331 = vmatpush.bf16.msrb.mxu1 %v2994_v60  ;;  %v2973_v60 = vld [vmem:[%s3193_s22 + $0x90] sm:$0xff] }
 0x10f   : > { %665 = vst [vmem:[#allocation1 + $0x2] ss:$9 sm:$0xff] %v596_v62  ;;  %v753_v62 = vrot.slane %v752_v54, 4 }
 0x110   : > { %v748_v11 = vrot.slane %v747_v61, 2 }
 0x112   : > { %v3260_v30 = vmax.f32 %v747_v61, %v748_v11  ;;  %v615_v61 = vrot.slane %v3218_v34, 7 }
 0x116   : > { %v3184_v2 = vld [vmem:[#allocation1] sm:$0xff] }
 0x117   : > { %667 = vst [vmem:[#allocation1] ss:$9 sm:$0xff] %v597_v0  ;;  %v729_v0 = vrot.slane %v728_v32, 1  ;;  %v794_v25 = vsel %vm723_vm1, %v3184_v2, -inf }
 0x118   : > { %668 = vst [vmem:[#allocation1 + $0x1] ss:$9 sm:$0xff] %v598_v1  ;;  %v735_v1 = vmax.f32 %v733_v45, %v734_v53  ;;  %v795_v37 = vrot.slane %v794_v25, 4  ;;  %v2974_v45 = vld [vmem:[%s3193_s22 + $0x98] sm:$0xff]  ;;  %v614_v53 = vrot.slane %v3218_v34, 6 }
 0x119   : > { %669 = vst [vmem:[#allocation1 + $0x2] ss:$9 sm:$0xff] %v599_v3  ;;  %v759_v3 = vsel %vm723_vm1, %v3172_v42, -inf  ;;  %v3247_v17 = vmax.f32 %v728_v32, %v729_v0 }
 0x11a   : > { %v760_v16 = vrot.slane %v759_v3, 4  ;;  %v796_v56 = vmax.f32 %v794_v25, %v795_v37  ;;  %v2988_v37 = vld [vmem:[%s3135_s10 + $0x38] sm:$0xff] }
 0x120   : > { %v3187_v8 = vld [vmem:[#allocation1] sm:$0xff] }
 0x121   : > { %671 = vst [vmem:[#allocation1] ss:$9 sm:$0xff] %v600_v6  ;;  %v801_v42 = vsel %vm723_vm1, %v3187_v8, -inf }
 0x122   : > { %672 = vst [vmem:[#allocation1 + $0x1] ss:$9 sm:$0xff] %v601_v7  ;;  %v2966_v7 = vld [vmem:[%s3193_s22 + $0x58] sm:$0xff]  ;;  %v802_v31 = vrot.slane %v801_v42, 4 }
 0x123   : > { %673 = vst [vmem:[#allocation1 + $0x2] ss:$9 sm:$0xff] %v558_v9  ;;  %v2976_v9 = vld [vmem:[%s3193_s22 + $0xa8] sm:$0xff]  ;;  %1154 = vmatpush.bf16.msra.mxu2 %v2966_v7 }
 0x124   : > { %1166 = vmatpush.bf16.msra.mxu3 %v2976_v9  ;;  %v803_v24 = vmax.f32 %v801_v42, %v802_v31 }
 0x128   : > { %1167 = vmatpush.bf16.msra.mxu3 %v2975_v27 }
 0x12a   : > { %v3202_v14 = vld [vmem:[#allocation1] sm:$0xff] }
 0x12b   : > { %675 = vst [vmem:[#allocation1] ss:$9 sm:$0xff] %v602_v12  ;;  %v612_v12 = vrot.slane %v3218_v34, 4  ;;  %v808_v20 = vsel %vm723_vm1, %v3202_v14, -inf  ;;  %v773_v14 = vsel %vm723_vm1, %v3177_v51, -inf  ;;  %v3269_v51 = vmax.f32 %v742_v4, %v743_v21  ;;  %v2972_v21 = vld [vmem:[%s3193_s22 + $0x88] sm:$0xff] }
 0x12c   : > { %676 = vst [vmem:[#allocation1 + $0x1] ss:$9 sm:$0xff] %v603_v13  ;;  %v2993_v13 = vld [vmem:[%s3135_s10 + $0x60] sm:$0xff]  ;;  %v809_v35 = vrot.slane %v808_v20, 4  ;;  %v774_v40 = vrot.slane %v773_v14, 4  ;;  %1168 = vmatpush.bf16.msra.mxu3 %v2974_v45  ;;  %v804_v4 = vrot.slane %v803_v24, 2 }
 0x12d   : > { %677 = vst [vmem:[#allocation1 + $0x2] ss:$9 sm:$0xff] %v604_v15  ;;  %v754_v15 = vmax.f32 %v752_v54, %v753_v62  ;;  %1332 = vmatpush.bf16.msrb.mxu1 %v2993_v13 }
 0x12e   : > { %v810_v32 = vmax.f32 %v808_v20, %v809_v35  ;;  %v775_v62 = vmax.f32 %v773_v14, %v774_v40  ;;  %v2996_v20 = vld [vmem:[%s3135_s10 + $0x78] sm:$0xff]  ;;  %v780_v14 = vsel %vm723_vm1, %v3179_v57, -inf }
 0x12f   : > { %v755_v18 = vrot.slane %v754_v15, 2  ;;  %v781_v57 = vrot.slane %v780_v14, 4 }
 0x130   : > { %v811_v9 = vrot.slane %v810_v32, 2  ;;  %1169 = vmatpush.bf16.msra.mxu3 %v2973_v60 }
 0x131   : > { %1333 = vmatpush.bf16.msrb.mxu1 %v2992_v29  ;;  %v756_v50 = vmax.f32 %v754_v15, %v755_v18 }
 0x132   : > { %v812_v27 = vmax.f32 %v810_v32, %v811_v9  ;;  %v787_v9 = vsel %vm723_vm1, %v3182_v63, -inf }
 0x133   : > { %v757_v7 = vrot.slane %v756_v50, 1 }
 0x134   : > { %v3209_v23 = vld [vmem:[#allocation1] sm:$0xff]  ;;  %1170 = vmatpush.bf16.msra.mxu3 %v2972_v21 }
 0x135   : > { %679 = vst [vmem:[#allocation1] ss:$9 sm:$0xff] %v605_v19  ;;  %v736_v19 = vrot.slane %v735_v1, 1  ;;  %v815_v8 = vsel %vm723_vm1, %v3209_v23, -inf  ;;  %1334 = vmatpush.bf16.msrb.mxu1 %v2991_v46  ;;  %v3299_v35 = vmax.f32 %v756_v50, %v757_v7 }
 0x136   : > { %680 = vst [vmem:[#allocation1 + $0x1] ss:$9 sm:$0xff] %v606_v22  ;;  %v766_v22 = vsel %vm723_vm1, %v3174_v47, -inf  ;;  %v761_v47 = vmax.f32 %v759_v3, %v760_v16  ;;  %v816_v38 = vrot.slane %v815_v8, 4  ;;  %v2990_v3 = vld [vmem:[%s3135_s10 + $0x48] sm:$0xff]  ;;  %v776_v16 = vrot.slane %v775_v62, 2 }
 0x137   : > { %681 = vst [vmem:[#allocation1 + $0x2] ss:$9 sm:$0xff] %v607_v26  ;;  %v2965_v26 = vld [vmem:[%s3193_s22 + $0x50] sm:$0xff]  ;;  %v3267_v23 = vmax.f32 %v735_v1, %v736_v19  ;;  %v767_v36 = vrot.slane %v766_v22, 4 }
 0x138   : > { %1155 = vmatpush.bf16.msra.mxu2 %v2965_v26  ;;  %v762_v52 = vrot.slane %v761_v47, 2  ;;  %v817_v58 = vmax.f32 %v815_v8, %v816_v38  ;;  %v805_v8 = vmax.f32 %v803_v24, %v804_v4 }
 0x139   : > { %v768_v55 = vmax.f32 %v766_v22, %v767_v36  ;;  %1335 = vmatpush.bf16.msrb.mxu1 %v2990_v3  ;;  %v2989_v22 = vld [vmem:[%s3135_s10 + $0x40] sm:$0xff] }
 0x13a   : > { %v763_v11 = vmax.f32 %v761_v47, %v762_v52  ;;  %v818_v13 = vrot.slane %v817_v58, 2  ;;  %v2971_v47 = vld [vmem:[%s3193_s22 + $0x80] sm:$0xff] }
 0x13b   : > { %1171 = vmatpush.bf16.msra.mxu3 %v2971_v47 }
 0x13c   : > { %1156 = vmatpush.bf16.msra.mxu2 %v2964_v44  ;;  %v764_v31 = vrot.slane %v763_v11, 1  ;;  %v819_v18 = vmax.f32 %v817_v58, %v818_v13  ;;  %v782_v58 = vmax.f32 %v780_v14, %v781_v57 }
 0x13d   : > { %1336 = vmatpush.bf16.msrb.mxu1 %v2989_v22  ;;  %v788_v22 = vrot.slane %v787_v9, 4 }
 0x13e   : > { %v3225_v28 = vld [vmem:[#allocation1] sm:$0xff]  ;;  %v3306_v46 = vmax.f32 %v763_v11, %v764_v31  ;;  %v783_v13 = vrot.slane %v782_v58, 2 }
 0x13f   : > { %683 = vst [vmem:[#allocation1] ss:$9 sm:$0xff] %v608_v41  ;;  %v822_v33 = vsel %vm723_vm1, %v3225_v28, -inf }
 0x140   : > { %684 = vst [vmem:[#allocation1 + $0x1] ss:$9 sm:$0xff] %v3218_v34  ;;  %v823_v41 = vrot.slane %v822_v33, 4  ;;  %v881_v34 = vsel %vm880_vm2, %v3267_v23, %v3247_v17  ;;  %1157 = vmatpush.bf16.msra.mxu2 %v2963_v59  ;;  %v2987_v59 = vld [vmem:[%s3135_s10 + $0x30] sm:$0xff]  ;;  %v784_v31 = vmax.f32 %v782_v58, %v783_v13 }
 0x141   : > { %685 = vst [vmem:[#allocation1 + $0x2] ss:$9 sm:$0xff] %v609_v43  ;;  %v750_v43 = vrot.slane %v3260_v30, 1  ;;  %v883_v19 = vsel %vm882_vm3, %v3269_v51, %v881_v34  ;;  %1337 = vmatpush.bf16.msrb.mxu1 %v2988_v37 }
 0x142   : > { %v824_v0 = vmax.f32 %v822_v33, %v823_v41  ;;  %v806_v41 = vrot.slane %v805_v8, 1 }
 0x143   : > { %v3294_v17 = vmax.f32 %v3260_v30, %v750_v43 }
 0x144   : > { %v825_v42 = vrot.slane %v824_v0, 2  ;;  %1366 = vmatpush.bf16.msrb.mxu2 %v2996_v20 }
 0x145   : > { %1338 = vmatpush.bf16.msrb.mxu1 %v2987_v59 }
 0x146   : > { %v826_v36 = vmax.f32 %v824_v0, %v825_v42 }
 0x148   : > { %v686_v6 = vld [vmem:[#allocation1] sm:$0xff]  ;;  %v827_v32 = vrot.slane %v826_v36, 1 }
 0x149   : > { %687 = vst [vmem:[#allocation1] ss:$9 sm:$0xff] %v610_v39  ;;  %v829_v2 = vsel %vm723_vm1, %v686_v6, -inf  ;;  %v551_v39 = vadd.f32 %v3157_v10, %v550_v49  ;;  %v769_v10 = vrot.slane %v768_v55, 2  ;;  %v820_v49 = vrot.slane %v819_v18, 1 }
 0x14a   : > { %688 = vst [vmem:[#allocation1 + $0x1] ss:$9 sm:$0xff] %v611_v5  ;;  %v830_v28 = vrot.slane %v829_v2, 4  ;;  %v3322_v7 = vmax.f32 %v826_v36, %v827_v32  ;;  %v789_v36 = vmax.f32 %v787_v9, %v788_v22 }
 0x14b   : > { %689 = vst [vmem:[#allocation1 + $0x2] ss:$9 sm:$0xff] %v612_v12  ;;  %v797_v12 = vrot.slane %v796_v56, 2  ;;  %v3291_v25 = vmax.f32 %v551_v39, 0.0  ;;  %v770_v30 = vmax.f32 %v768_v55, %v769_v10  ;;  %v3316_v39 = vmax.f32 %v819_v18, %v820_v49 }
 0x14c   : > { %v831_v5 = vmax.f32 %v829_v2, %v830_v28  ;;  %v777_v2 = vmax.f32 %v775_v62, %v776_v16  ;;  %v813_v28 = vrot.slane %v812_v27, 1 }
 0x14d   : > { %v798_v33 = vmax.f32 %v796_v56, %v797_v12  ;;  %v616_v40 = vrot.slane %v3291_v25, 1  ;;  %v617_v24 = vrot.slane %v3291_v25, 2  ;;  %v771_v52 = vrot.slane %v770_v30, 1 }
 0x14e   : > { %v832_v26 = vrot.slane %v831_v5, 2  ;;  %v778_v60 = vrot.slane %v777_v2, 1 }
 0x150   : > { %v833_v43 = vmax.f32 %v831_v5, %v832_v26  ;;  %v3330_v10 = vmax.f32 %v777_v2, %v778_v60 }
 0x152   : > { %v690_v54 = vld [vmem:[#allocation1] sm:$0xff]  ;;  %v834_v55 = vrot.slane %v833_v43, 1 }
 0x153   : > { %691 = vst [vmem:[#allocation1] ss:$9 sm:$0xff] %v613_v48  ;;  %v836_v1 = vsel %vm723_vm1, %v690_v54, -inf  ;;  %v799_v48 = vrot.slane %v798_v33, 1  ;;  %v807_v54 = vmax.f32 %v805_v8, %v806_v41  ;;  %v620_v8 = vrot.slane %v3291_v25, 5 }
 0x154   : > { %692 = vst [vmem:[#allocation1 + $0x1] ss:$9 sm:$0xff] %v614_v53  ;;  %v837_v6 = vrot.slane %v836_v1, 4  ;;  %v885_v53 = vsel %vm884_vm4, %v3294_v17, %v883_v19  ;;  %v3326_v34 = vmax.f32 %v833_v43, %v834_v55  ;;  %v619_v19 = vrot.slane %v3291_v25, 4 }
 0x155   : > { %693 = vst [vmem:[#allocation1 + $0x2] ss:$9 sm:$0xff] %v615_v61  ;;  %v3311_v61 = vmax.f32 %v812_v27, %v813_v28  ;;  %v887_v0 = vsel %vm886_vm5, %v3299_v35, %v885_v53  ;;  %v800_v3 = vmax.f32 %v798_v33, %v799_v48  ;;  %v905_v41 = vsel %vm880_vm2, %v3269_v51, %v3267_v23 }
 0x156   : > { %v838_v15 = vmax.f32 %v836_v1, %v837_v6  ;;  %v2995_v1 = vld [vmem:[%s3135_s10 + $0x70] sm:$0xff]  ;;  %v889_v5 = vsel %vm888_vm6, %v3306_v46, %v887_v0  ;;  %v3320_v6 = vmax.f32 %v770_v30, %v771_v52  ;;  %v906_v57 = vsel %vm882_vm3, %v3294_v17, %v905_v41  ;;  %s3381_s10 = scalar_lea.vmem %s3706_s1, %s2941_s26 }
 0x157   : > { %1367 = vmatpush.bf16.msrb.mxu2 %v2995_v1  ;;  %v894_v12 = vsel %vm880_vm2, %v807_v54, %v800_v3  ;;  %v790_v28 = vrot.slane %v789_v36, 2  ;;  %v2985_v41 = vld [vmem:[%s3381_s10 + $0x34] sm:$0xf] }
 0x158   : > { %v839_v29 = vrot.slane %v838_v15, 2  ;;  %v895_v42 = vsel %vm882_vm3, %v3311_v61, %v894_v12  ;;  %v891_v18 = vsel %vm890_vm7, %v3320_v6, %v889_v5  ;;  %v2980_v12 = vld [vmem:[%s3381_s10 + $0x4] sm:$0xf0] }
 0x159   : > { %v896_v21 = vsel %vm884_vm4, %v3316_v39, %v895_v42  ;;  %v893_v47 = vsel %vm892_vm8, %v3330_v10, %v891_v18  ;;  %v791_v58 = vmax.f32 %v789_v36, %v790_v28  ;;  %v930_v42 = vsel %vm880_vm2, %v3316_v39, %v3311_v61  ;;  %v2981_v18 = vld [vmem:[%s3381_s10 + $0x14] sm:$0xf]  ;;  %v2986_v28 = vld [vmem:[%s3381_s10 + $0x34] sm:$0xf0] }
 0x15a   : > { %v840_v44 = vmax.f32 %v838_v15, %v839_v29  ;;  %v618_v15 = vrot.slane %v3291_v25, 3  ;;  %v897_v26 = vsel %vm886_vm5, %v3322_v7, %v896_v21 }
 0x15b   : > { %v898_v14 = vsel %vm888_vm6, %v3326_v34, %v897_v26  ;;  %v792_v5 = vrot.slane %v791_v58, 1 }
 0x15c   : > { %v694_v38 = vld [vmem:[#allocation1] sm:$0xff]  ;;  %v841_v62 = vrot.slane %v840_v44, 1 }
 0x15d   : > { %695 = vst [vmem:[#allocation1] ss:$9 sm:$0xff] %v3291_v25  ;;  %v843_v45 = vsel %vm723_vm1, %v694_v38, -inf  ;;  %v785_v38 = vrot.slane %v784_v31, 1  ;;  %v793_v21 = vmax.f32 %v791_v58, %v792_v5 }
 0x15e   : > { %696 = vst [vmem:[#allocation1 + $0x1] ss:$9 sm:$0xff] %v616_v40  ;;  %v844_v50 = vrot.slane %v843_v45, 4  ;;  %v3332_v16 = vmax.f32 %v840_v44, %v841_v62  ;;  %v907_v44 = vsel %vm884_vm4, %v3299_v35, %v906_v57  ;;  %v2649_v57 = vld [vmem:[%s3381_s10 + $0x30] sm:$0xf] }
 0x15f   : > { %697 = vst [vmem:[#allocation1 + $0x2] ss:$9 sm:$0xff] %v617_v24  ;;  %v912_v24 = vsel %vm880_vm2, %v3311_v61, %v807_v54  ;;  %v786_v49 = vmax.f32 %v784_v31, %v785_v38  ;;  %v908_v23 = vsel %vm886_vm5, %v3306_v46, %v907_v44  ;;  %v2982_v31 = vld [vmem:[%s3381_s10 + $0x14] sm:$0xf0]  ;;  %v2643_v38 = vld [vmem:[%s3381_s10 + $0x28] sm:$0xf0]  ;;  %v2650_v44 = vor.u32 %v2986_v28, %v2649_v57 }
 0x160   : > { %v845_v56 = vmax.f32 %v843_v45, %v844_v50  ;;  %v899_v25 = vsel %vm890_vm7, %v3332_v16, %v898_v14  ;;  %v913_v45 = vsel %vm882_vm3, %v3316_v39, %v912_v24  ;;  %v909_v32 = vsel %vm888_vm6, %v3320_v6, %v908_v23  ;;  %v2627_v14 = vld [vmem:[%s3381_s10 + $0x8] sm:$0xf0]  ;;  %v3040_v23 = vld [vmem:[%s3435_s15 + $0x18] sm:$0xff] }
 0x161   : > { %v914_v52 = vsel %vm884_vm4, %v3322_v7, %v913_v45  ;;  %v910_v60 = vsel %vm890_vm7, %v3330_v10, %v909_v32  ;;  %v3044_v45 = vld [vmem:[%s3435_s15 + $0x38] sm:$0xff] }
 0x162   : > { %v846_v4 = vrot.slane %v845_v56, 2  ;;  %v915_v53 = vsel %vm886_vm5, %v3326_v34, %v914_v52  ;;  %v911_v0 = vsel %vm892_vm8, %v786_v49, %v910_v60  ;;  %v3037_v60 = vld [vmem:[%s3435_s15] sm:$0xff]  ;;  %v3004_v28 = vld [vmem:[%s3193_s22 + $0xf8] sm:$0xff] }
 0x163   : > { %2075 = vmatpush.bf16.msrb.mxu3 %v3004_v28 }
 0x164   : > { %v847_v11 = vmax.f32 %v845_v56, %v846_v4  ;;  %v916_v56 = vsel %vm888_vm6, %v3332_v16, %v915_v53  ;;  %v3039_v53 = vld [vmem:[%s3435_s15 + $0x10] sm:$0xff] }
 0x166   : > { %v698_v63 = vld [vmem:[#allocation1] sm:$0xff]  ;;  %v848_v20 = vrot.slane %v847_v11, 1 }
 0x167   : > { %699 = vst [vmem:[#allocation1] ss:$9 sm:$0xff] %v618_v15  ;;  %v850_v27 = vsel %vm723_vm1, %v698_v63, -inf  ;;  %v923_v15 = vsel %vm880_vm2, %v3294_v17, %v3269_v51  ;;  %v931_v63 = vsel %vm882_vm3, %v3322_v7, %v930_v42 }
 0x168   : > { %700 = vst [vmem:[#allocation1 + $0x1] ss:$9 sm:$0xff] %v619_v19  ;;  %v849_v29 = vmax.f32 %v847_v11, %v848_v20  ;;  %v851_v33 = vrot.slane %v850_v27, 4  ;;  %v2625_v11 = vld [vmem:[%s3381_s10] sm:$0xf]  ;;  %v924_v19 = vsel %vm882_vm3, %v3299_v35, %v923_v15  ;;  %v932_v51 = vsel %vm884_vm4, %v3326_v34, %v931_v63 }
 0x169   : > { %701 = vst [vmem:[#allocation1 + $0x2] ss:$9 sm:$0xff] %v620_v8  ;;  %v2626_v20 = vor.u32 %v2980_v12, %v2625_v11  ;;  %v925_v8 = vsel %vm884_vm4, %v3306_v46, %v924_v19  ;;  %v933_v35 = vsel %vm886_vm5, %v3332_v16, %v932_v51 }
 0x16a   : > { %v900_v30 = vsel %vm892_vm8, %v849_v29, %v899_v25  ;;  %v852_v2 = vmax.f32 %v850_v27, %v851_v33  ;;  %v917_v62 = vsel %vm890_vm7, %v849_v29, %v916_v56  ;;  %v926_v17 = vsel %vm886_vm5, %v3320_v6, %v925_v8  ;;  %v2979_v27 = vld [vmem:[%s3381_s10 + $0x4] sm:$0xf]  ;;  %v2635_v25 = vld [vmem:[%s3381_s10 + $0x18] sm:$0xf0]  ;;  %v3038_v56 = vld [vmem:[%s3435_s15 + $0x8] sm:$0xff] }
 0x16b   : > { %v988_v37 = vpack.c.bf16 %v900_v30, %v893_v47  ;;  %v927_v39 = vsel %vm888_vm6, %v3330_v10, %v926_v17  ;;  %v934_v7 = vsel %vm888_vm6, %v849_v29, %v933_v35  ;;  %v2630_v10 = vor.u32 %v2979_v27, %v2627_v14  ;;  %v2633_v29 = vld [vmem:[%s3381_s10 + $0x10] sm:$0xf]  ;;  %v2641_v30 = vld [vmem:[%s3381_s10 + $0x20] sm:$0xf] }
 0x16c   : > { %v853_v40 = vrot.slane %v852_v2, 2  ;;  %v928_v26 = vsel %vm890_vm7, %v786_v49, %v927_v39  ;;  %v2634_v33 = vor.u32 %v2982_v31, %v2633_v29  ;;  %v2638_v47 = vor.u32 %v2981_v18, %v2635_v25  ;;  %v3042_v49 = vld [vmem:[%s3435_s15 + $0x28] sm:$0xff] }
 0x16d   : > { %1144 = vmatmul.bf16.vlgmr.msra.gmra.mxu1 %v988_v37  ;;  %v929_v6 = vsel %vm892_vm8, %v793_v21, %v928_v26  ;;  %v2983_v37 = vld [vmem:[%s3381_s10 + $0x24] sm:$0xf] }
 0x16e   : > { %v854_v43 = vmax.f32 %v852_v2, %v853_v40  ;;  %v2984_v2 = vld [vmem:[%s3381_s10 + $0x24] sm:$0xf0]  ;;  %v2646_v40 = vor.u32 %v2983_v37, %v2643_v38  ;;  %2303 = vmatpush.bf16.msra.mxu1 %v3044_v45  ;;  %v3003_v45 = vld [vmem:[%s3193_s22 + $0xf0] sm:$0xff] }
 0x16f   : > { %v2642_v36 = vor.u32 %v2984_v2, %v2641_v30  ;;  %2076 = vmatpush.bf16.msrb.mxu3 %v3003_v45 }
 0x170   : > { %v702_v48 = vld [vmem:[#allocation1] sm:$0xff]  ;;  %v855_v50 = vrot.slane %v854_v43, 1 }
 0x171   : > { %v857_v54 = vsel %vm723_vm1, %v702_v48, -inf  ;;  %v3043_v48 = vld [vmem:[%s3435_s15 + $0x30] sm:$0xff] }
 0x172   : > { %v856_v55 = vmax.f32 %v854_v43, %v855_v50  ;;  %v858_v59 = vrot.slane %v857_v54, 4  ;;  %v2651_v43 = vld [vmem:[%s3381_s10 + $0x38] sm:$0xf0]  ;;  %2304 = vmatpush.bf16.msra.mxu1 %v3043_v48  ;;  %v3041_v50 = vld [vmem:[%s3435_s15 + $0x20] sm:$0xff]  ;;  %v3011_v48 = vld [vmem:[%s3193_s22 + $0x130] sm:$0xff] }
 0x173   : > { %v2654_v24 = vor.u32 %v2985_v41, %v2651_v43 }
 0x174   : > { %v918_v1 = vsel %vm892_vm8, %v856_v55, %v917_v62  ;;  %v859_v3 = vmax.f32 %v857_v54, %v858_v59  ;;  %v935_v46 = vsel %vm890_vm7, %v856_v55, %v934_v7  ;;  %v3062_v54 = vld [vmem:[%s3200_s25] ss:$0 sm:$0xff] }
 0x175   : > { %v989_v4 = vpack.c.bf16 %v918_v1, %v911_v0  ;;  %v3447_v0 = vld [vmem:[%s3146_s14 + $0x1] ss:$0 sm:$0xff] }
 0x176   : > { %v860_v9 = vrot.slane %v859_v3, 2  ;;  %2305 = vmatpush.bf16.msra.mxu1 %v3042_v49  ;;  %v3027_v49 = vld [vmem:[%s3193_s22 + $0x1b0] sm:$0xff] }
 0x177   : > { %1158 = vmatmul.bf16.vlgmr.msra.gmra.mxu2 %v989_v4 }
 0x178   : > { %v861_v13 = vmax.f32 %v859_v3, %v860_v9 }
 0x17a   : > { %v862_v22 = vrot.slane %v861_v13, 1  ;;  %2306 = vmatpush.bf16.msra.mxu1 %v3041_v50 }
 0x17c   : > { %v863_v61 = vmax.f32 %v861_v13, %v862_v22 }
 0x17d   : > { %1339 = vmatmul.bf16.vlgmr.msrb.gmra.mxu1 %v2626_v20 }
 0x17e   : > { %v936_v34 = vsel %vm892_vm8, %v863_v61, %v935_v46  ;;  %2307 = vmatpush.bf16.msra.mxu1 %v3040_v23 }
 0x17f   : > { %v990_v16 = vpack.c.bf16 %v936_v34, %v929_v6 }
 0x181   : > { %1172 = vmatmul.bf16.vlgmr.msra.gmra.mxu3 %v990_v16 }
 0x182   : > { %2308 = vmatpush.bf16.msra.mxu1 %v3039_v53 }
 0x186   : > { %2309 = vmatpush.bf16.msra.mxu1 %v3038_v56 }
 0x187   : > { %2695 = vmatmul.msk.bf16.vlgmr.msrb.gmra.mxu2 %vm1318_vm9, %v2630_v10 }
 0x18a   : > { %2310 = vmatpush.bf16.msra.mxu1 %v3037_v60  ;;  %v3001_v60 = vld [vmem:[%s3193_s22 + $0xe0] sm:$0xff] }
 0x18d   : > { %1344 = vmatmul.bf16.gmra.mxu1 %v2634_v33 }
 0x197   : > { %2696 = vmatmul.msk.bf16.gmra.mxu2 %vm1318_vm9, %v2638_v47 }
 0x19d   : > { %1349 = vmatmul.bf16.gmra.mxu1 %v2642_v36 }
 0x1a7   : > { %2697 = vmatmul.msk.bf16.gmra.mxu2 %vm1318_vm9, %v2646_v40 }
 0x1ad   : > { %1354 = vmatmul.bf16.gmra.mxu1 %v2650_v44  ;;  %v3028_v44 = vld [vmem:[%s3193_s22 + $0x1b8] sm:$0xff] }
 0x1ae   : > { %2117 = vmatpush.bf16.msra.mxu2 %v3028_v44 }
 0x1b2   : > { %2118 = vmatpush.bf16.msra.mxu2 %v3027_v49 }
 0x1b7   : > { %2698 = vmatmul.msk.bf16.gmra.mxu2 %vm1318_vm9, %v2654_v24  ;;  %v3012_v24 = vld [vmem:[%s3193_s22 + $0x138] sm:$0xff] }
 0x1b8   : > { %2089 = vmatpush.bf16.msrb.mxu0 %v3012_v24 }
 0x1bc   : > { %2090 = vmatpush.bf16.msrb.mxu0 %v3011_v48 }
 0x1ea   : > { %v1145_v52 = vpop.f32.mrf.mxu1 }
 0x1eb   : > { %v1146_v58 = vadd.f32 %v3062_v54, %v1145_v52  ;;  %v3002_v52 = vld [vmem:[%s3193_s22 + $0xe8] sm:$0xff] }
 0x1ec   : > { %2077 = vmatpush.bf16.msrb.mxu3 %v3002_v52 }
 0x1f0   : > { %2078 = vmatpush.bf16.msrb.mxu3 %v3001_v60 }
 0x1f2   : > { %v1147_v55 = vpop.f32.mrf.mxu1 }
 0x1f3   : > { %v1148_v11 = vadd.f32 %v3062_v54, %v1147_v55 }
 0x1fa   : > { %v1159_v32 = vpop.f32.mrf.mxu2  ;;  %v1340_v4 = vpop.f32.mrf.mxu1 }
 0x1fb   : > { %v1160_v62 = vadd.f32 %v1159_v32, %v1146_v58  ;;  %v1341_v5 = vadd.f32 %v3447_v0, %v1340_v4  ;;  %v3010_v32 = vld [vmem:[%s3193_s22 + $0x128] sm:$0xff]  ;;  %v3000_v4 = vld [vmem:[%s3193_s22 + $0xd8] sm:$0xff] }
 0x1fc   : > { %2091 = vmatpush.bf16.msrb.mxu0 %v3010_v32  ;;  %2079 = vmatpush.bf16.msrb.mxu3 %v3000_v4 }
 0x202   : > { %v1161_v59 = vpop.f32.mrf.mxu2  ;;  %v1342_v29 = vpop.f32.mrf.mxu1 }
 0x203   : > { %v1162_v15 = vadd.f32 %v1161_v59, %v1148_v11  ;;  %v1343_v25 = vadd.f32 %v3447_v0, %v1342_v29 }
 0x204   : > { %v1173_v1 = vpop.f32.mrf.mxu3 }
 0x205   : > { %v1174_v3 = vadd.f32 %v1173_v1, %v1160_v62  ;;  %v3009_v62 = vld [vmem:[%s3193_s22 + $0x120] sm:$0xff]  ;;  %v3026_v1 = vld [vmem:[%s3193_s22 + $0x1a8] sm:$0xff] }
 0x206   : > { %2119 = vmatpush.bf16.msra.mxu2 %v3026_v1  ;;  %2092 = vmatpush.bf16.msrb.mxu0 %v3009_v62 }
 0x207   : > { %v1178_v9 = vmax.f32 %v1174_v3, 0.0 }
 0x209   : > { %v1180_v12 = vrot.slane %v1178_v9, 4 }
 0x20a   : > { %v1369_v13 = vpop.f32.mrf.mxu2  ;;  %v1345_v50 = vpop.f32.mrf.mxu1 }
 0x20b   : > { %v1181_v42 = vmax.f32 %v1178_v9, %v1180_v12  ;;  %v1370_v19 = vadd.f32 %v1369_v13, %v1341_v5  ;;  %v1346_v23 = vadd.f32 %v3447_v0, %v1345_v50  ;;  %v3008_v5 = vld [vmem:[%s3193_s22 + $0x118] sm:$0xff]  ;;  %v3025_v9 = vld [vmem:[%s3193_s22 + $0x1a0] sm:$0xff]  ;;  %v2999_v13 = vld [vmem:[%s3193_s22 + $0xd0] sm:$0xff] }
 0x20c   : > { %v1175_v63 = vpop.f32.mrf.mxu3  ;;  %2093 = vmatpush.bf16.msrb.mxu0 %v3008_v5  ;;  %2120 = vmatpush.bf16.msra.mxu2 %v3025_v9 }
 0x20d   : > { %v1176_v20 = vadd.f32 %v1175_v63, %v1162_v15  ;;  %v1389_v21 = vmax.f32 %v1370_v19, 0.0  ;;  %v1182_v22 = vrot.slane %v1181_v42, 2  ;;  %v3007_v15 = vld [vmem:[%s3193_s22 + $0x110] sm:$0xff]  ;;  %v3024_v19 = vld [vmem:[%s3193_s22 + $0x198] sm:$0xff]  ;;  %2080 = vmatpush.bf16.msrb.mxu3 %v2999_v13  ;;  %v2998_v63 = vld [vmem:[%s3193_s22 + $0xc8] sm:$0xff] }
 0x20e   : > { %v3005_v13 = vld [vmem:[%s3193_s22 + $0x100] sm:$0xff] }
 0x20f   : > { %v1179_v8 = vmax.f32 %v1176_v20, 0.0  ;;  %v1405_v51 = vrot.slane %v1389_v21, 1  ;;  %v1406_v17 = vrot.slane %v1389_v21, 2  ;;  %1451 = vst [vmem:[#allocation1] ss:$9 sm:$0xff] %v1389_v21  ;;  %v1183_v61 = vmax.f32 %v1181_v42, %v1182_v22  ;;  %v3006_v20 = vld [vmem:[%s3193_s22 + $0x108] sm:$0xff] }
 0x210   : > { %v1407_v6 = vrot.slane %v1389_v21, 3  ;;  %v1408_v16 = vrot.slane %v1389_v21, 4  ;;  %v1409_v14 = vrot.slane %v1389_v21, 5  ;;  %v1410_v2 = vrot.slane %v1389_v21, 6  ;;  %2094 = vmatpush.bf16.msrb.mxu0 %v3007_v15  ;;  %2121 = vmatpush.bf16.msra.mxu2 %v3024_v19  ;;  %v3020_v22 = vld [vmem:[%s3193_s22 + $0x178] sm:$0xff]  ;;  %v3023_v15 = vld [vmem:[%s3193_s22 + $0x190] sm:$0xff] }
 0x211   : > { %v1186_v35 = vrot.slane %v1179_v8, 4  ;;  %1453 = vst [vmem:[#allocation1 + $0x1] ss:$9 sm:$0xff] %v1405_v51  ;;  %v1184_v26 = vrot.slane %v1183_v61, 1  ;;  %v1411_v36 = vrot.slane %v1389_v21, 7  ;;  %2081 = vmatpush.bf16.msrb.mxu3 %v2998_v63  ;;  %v2997_v21 = vld [vmem:[%s3193_s22 + $0xc0] sm:$0xff] }
 0x212   : > { %1455 = vst [vmem:[#allocation1 + $0x2] ss:$9 sm:$0xff] %v1406_v17  ;;  %v1371_v33 = vpop.f32.mrf.mxu2  ;;  %v3016_v19 = vld [vmem:[%s3193_s22 + $0x158] sm:$0xff] }
 0x213   : > { %v1187_v39 = vmax.f32 %v1179_v8, %v1186_v35  ;;  %v1185_v10 = vmax.f32 %v1183_v61, %v1184_v26  ;;  %v1372_v30 = vadd.f32 %v1371_v33, %v1343_v25  ;;  %v3019_v61 = vld [vmem:[%s3193_s22 + $0x170] sm:$0xff] }
 0x214   : > { %2095 = vmatpush.bf16.msrb.mxu0 %v3006_v20  ;;  %v3036_v20 = vld [vmem:[%s3193_s22 + $0x1f8] sm:$0xff]  ;;  %2122 = vmatpush.bf16.msra.mxu2 %v3023_v15 }
 0x215   : > { %v1188_v7 = vrot.slane %v1187_v39, 2  ;;  %v1390_v38 = vmax.f32 %v1372_v30, 0.0  ;;  %2082 = vmatpush.bf16.msrb.mxu3 %v2997_v21 }
 0x217   : > { %v1189_v46 = vmax.f32 %v1187_v39, %v1188_v7  ;;  %v1412_v40 = vrot.slane %v1390_v38, 1  ;;  %v1413_v41 = vrot.slane %v1390_v38, 2  ;;  %v1414_v57 = vrot.slane %v1390_v38, 3  ;;  %v1347_v39 = vpop.f32.mrf.mxu1  ;;  %v3018_v7 = vld [vmem:[%s3193_s22 + $0x168] sm:$0xff] }
 0x218   : > { %v1415_v53 = vrot.slane %v1390_v38, 4  ;;  %v1416_v54 = vrot.slane %v1390_v38, 5  ;;  %v1417_v58 = vrot.slane %v1390_v38, 6  ;;  %v1418_v11 = vrot.slane %v1390_v38, 7  ;;  %2096 = vmatpush.bf16.msrb.mxu0 %v3005_v13 }
 0x219   : > { %v1190_v34 = vrot.slane %v1189_v46, 1  ;;  %v3450_v27 = vld [vmem:[#allocation1] sm:$0xff]  ;;  %2103 = vmatpush.bf16.msra.mxu3 %v3020_v22  ;;  %v1348_v26 = vadd.f32 %v3447_v0, %v1347_v39  ;;  %v3015_v39 = vld [vmem:[%s3193_s22 + $0x150] sm:$0xff] }
 0x21a   : > { %1457 = vst [vmem:[#allocation1] ss:$9 sm:$0xff] %v1407_v6  ;;  %v1374_v56 = vpop.f32.mrf.mxu2  ;;  %v1543_v1 = vsel %vm723_vm1, %v3450_v27, -inf }
 0x21b   : > { %v1191_v31 = vmax.f32 %v1189_v46, %v1190_v34  ;;  %1458 = vst [vmem:[#allocation1 + $0x1] ss:$9 sm:$0xff] %v1408_v16  ;;  %v1375_v59 = vadd.f32 %v1374_v56, %v1346_v23  ;;  %v3017_v16 = vld [vmem:[%s3193_s22 + $0x160] sm:$0xff] }
 0x21c   : > { %1459 = vst [vmem:[#allocation1 + $0x2] ss:$9 sm:$0xff] %v1409_v14  ;;  %2131 = vmatpush.bf16.msra.mxu0 %v3036_v20 }
 0x21d   : > { %v2163_v18 = vsel %vm880_vm2, %v1191_v31, %v1185_v10  ;;  %v1391_v3 = vmax.f32 %v1375_v59, 0.0  ;;  %2104 = vmatpush.bf16.msra.mxu3 %v3019_v61 }
 0x21e   : > { %v2169_v47 = vpack.c.bf16 %v2163_v18, %v2163_v18 }
 0x21f   : > { %v1419_v12 = vrot.slane %v1391_v3, 1  ;;  %v1420_v8 = vrot.slane %v1391_v3, 2  ;;  %v1421_v51 = vrot.slane %v1391_v3, 3  ;;  %v1422_v35 = vrot.slane %v1391_v3, 4  ;;  %v1350_v31 = vpop.f32.mrf.mxu1 }
 0x220   : > { %2311 = vmatmul.bf16.vlgmr.msra.gmra.mxu1 %v2169_v47  ;;  %v1423_v46 = vrot.slane %v1391_v3, 5  ;;  %v1424_v34 = vrot.slane %v1391_v3, 6  ;;  %v1425_v10 = vrot.slane %v1391_v3, 7  ;;  %v1351_v18 = vadd.f32 %v3447_v0, %v1350_v31 }
 0x221   : > { %2105 = vmatpush.bf16.msra.mxu3 %v3018_v7  ;;  %v3035_v7 = vld [vmem:[%s3193_s22 + $0x1f0] sm:$0xff] }
 0x222   : > { %v1376_v6 = vpop.f32.mrf.mxu2  ;;  %2132 = vmatpush.bf16.msra.mxu0 %v3035_v7 }
 0x223   : > { %v3454_v37 = vld [vmem:[#allocation1] sm:$0xff]  ;;  %v1377_v29 = vadd.f32 %v1376_v6, %v1348_v26 }
 0x224   : > { %1461 = vst [vmem:[#allocation1] ss:$9 sm:$0xff] %v1410_v2 }
 0x225   : > { %1462 = vst [vmem:[#allocation1 + $0x1] ss:$9 sm:$0xff] %v1411_v36  ;;  %2106 = vmatpush.bf16.msra.mxu3 %v3017_v16  ;;  %v1392_v33 = vmax.f32 %v1377_v29, 0.0 }
 0x226   : > { %1463 = vst [vmem:[#allocation1 + $0x2] ss:$9 sm:$0xff] %v1390_v38 }
 0x227   : > { %v1426_v47 = vrot.slane %v1392_v33, 1  ;;  %v1427_v36 = vrot.slane %v1392_v33, 2  ;;  %v1352_v44 = vpop.f32.mrf.mxu1 }
 0x228   : > { %v1353_v49 = vadd.f32 %v3447_v0, %v1352_v44 }
 0x229   : > { %2107 = vmatpush.bf16.msra.mxu3 %v3016_v19 }
 0x22a   : > { %v1379_v25 = vpop.f32.mrf.mxu2 }
 0x22b   : > { %v1380_v30 = vadd.f32 %v1379_v25, %v1351_v18 }
 0x22d   : > { %v3456_v43 = vld [vmem:[#allocation1] sm:$0xff]  ;;  %v1393_v38 = vmax.f32 %v1380_v30, 0.0  ;;  %2108 = vmatpush.bf16.msra.mxu3 %v3015_v39 }
 0x22e   : > { %1465 = vst [vmem:[#allocation1] ss:$9 sm:$0xff] %v1412_v40 }
 0x22f   : > { %1466 = vst [vmem:[#allocation1 + $0x1] ss:$9 sm:$0xff] %v1413_v41  ;;  %v1428_v40 = vrot.slane %v1393_v38, 1  ;;  %v1429_v41 = vrot.slane %v1393_v38, 2  ;;  %v1430_v24 = vrot.slane %v1393_v38, 3  ;;  %v1431_v28 = vrot.slane %v1393_v38, 4  ;;  %v1355_v5 = vpop.f32.mrf.mxu1 }
 0x230   : > { %1467 = vst [vmem:[#allocation1 + $0x2] ss:$9 sm:$0xff] %v1414_v57  ;;  %v1432_v48 = vrot.slane %v1393_v38, 5  ;;  %v1433_v52 = vrot.slane %v1393_v38, 6  ;;  %v1434_v32 = vrot.slane %v1393_v38, 7  ;;  %v1356_v21 = vadd.f32 %v3447_v0, %v1355_v5 }
 0x232   : > { %v1381_v50 = vpop.f32.mrf.mxu2 }
 0x233   : > { %v1382_v23 = vadd.f32 %v1381_v50, %v1353_v49  ;;  %v3022_v49 = vld [vmem:[%s3193_s22 + $0x188] sm:$0xff] }
 0x234   : > { %v3014_v50 = vld [vmem:[%s3193_s22 + $0x148] sm:$0xff]  ;;  %2123 = vmatpush.bf16.msra.mxu2 %v3022_v49 }
 0x235   : > { %2109 = vmatpush.bf16.msra.mxu3 %v3014_v50 }
 0x237   : > { %v3467_v55 = vld [vmem:[#allocation1] sm:$0xff] }
 0x238   : > { %1469 = vst [vmem:[#allocation1] ss:$9 sm:$0xff] %v1415_v53  ;;  %v1564_v63 = vsel %vm723_vm1, %v3467_v55, -inf }
 0x239   : > { %1470 = vst [vmem:[#allocation1 + $0x1] ss:$9 sm:$0xff] %v1416_v54  ;;  %v3502_v54 = vmax.f32 %v1382_v23, 0.0  ;;  %v1565_v26 = vrot.slane %v1564_v63, 4  ;;  %v3034_v23 = vld [vmem:[%s3193_s22 + $0x1e8] sm:$0xff] }
 0x23a   : > { %1471 = vst [vmem:[#allocation1 + $0x2] ss:$9 sm:$0xff] %v1417_v58  ;;  %v1550_v58 = vsel %vm723_vm1, %v3454_v37, -inf  ;;  %v1544_v37 = vrot.slane %v1543_v1, 4  ;;  %2133 = vmatpush.bf16.msra.mxu0 %v3034_v23 }
 0x23b   : > { %v1435_v56 = vrot.slane %v3502_v54, 1  ;;  %v1436_v59 = vrot.slane %v3502_v54, 2  ;;  %v1437_v62 = vrot.slane %v3502_v54, 3  ;;  %v1551_v4 = vrot.slane %v1550_v58, 4 }
 0x23c   : > { %v1438_v55 = vrot.slane %v3502_v54, 4  ;;  %v1439_v6 = vrot.slane %v3502_v54, 5  ;;  %v1440_v29 = vrot.slane %v3502_v54, 6 }
 0x23d   : > { %v1552_v27 = vmax.f32 %v1550_v58, %v1551_v4  ;;  %v1441_v4 = vrot.slane %v3502_v54, 7 }
 0x241   : > { %v3481_v42 = vld [vmem:[#allocation1] sm:$0xff] }
 0x242   : > { %1473 = vst [vmem:[#allocation1] ss:$9 sm:$0xff] %v1418_v11  ;;  %v1571_v22 = vsel %vm723_vm1, %v3481_v42, -inf }
 0x243   : > { %1474 = vst [vmem:[#allocation1 + $0x1] ss:$9 sm:$0xff] %v1391_v3  ;;  %v1557_v3 = vsel %vm723_vm1, %v3456_v43, -inf  ;;  %v1572_v42 = vrot.slane %v1571_v22, 4 }
 0x244   : > { %1475 = vst [vmem:[#allocation1 + $0x2] ss:$9 sm:$0xff] %v1419_v12  ;;  %v1558_v9 = vrot.slane %v1557_v3, 4 }
 0x24b   : > { %v3488_v17 = vld [vmem:[#allocation1] sm:$0xff] }
 0x24c   : > { %1477 = vst [vmem:[#allocation1] ss:$9 sm:$0xff] %v1420_v8 }
 0x24d   : > { %1478 = vst [vmem:[#allocation1 + $0x1] ss:$9 sm:$0xff] %v1421_v51  ;;  %v1545_v51 = vmax.f32 %v1543_v1, %v1544_v37 }
 0x24e   : > { %1479 = vst [vmem:[#allocation1 + $0x2] ss:$9 sm:$0xff] %v1422_v35  ;;  %v1559_v35 = vmax.f32 %v1557_v3, %v1558_v9  ;;  %v3033_v3 = vld [vmem:[%s3193_s22 + $0x1e0] sm:$0xff] }
 0x24f   : > { %v1546_v25 = vrot.slane %v1545_v51, 2  ;;  %2134 = vmatpush.bf16.msra.mxu0 %v3033_v3 }
 0x255   : > { %v3494_v14 = vld [vmem:[#allocation1] sm:$0xff] }
 0x256   : > { %1481 = vst [vmem:[#allocation1] ss:$9 sm:$0xff] %v1423_v46 }
 0x257   : > { %1482 = vst [vmem:[#allocation1 + $0x1] ss:$9 sm:$0xff] %v1424_v34  ;;  %v1384_v34 = vpop.f32.mrf.mxu2 }
 0x258   : > { %1483 = vst [vmem:[#allocation1 + $0x2] ss:$9 sm:$0xff] %v1425_v10  ;;  %v1553_v10 = vrot.slane %v1552_v27, 2  ;;  %v1385_v31 = vadd.f32 %v1384_v34, %v1356_v21  ;;  %v3032_v34 = vld [vmem:[%s3193_s22 + $0x1d8] sm:$0xff] }
 0x259   : > { %2135 = vmatpush.bf16.msra.mxu0 %v3032_v34 }
 0x25a   : > { %v3534_v44 = vmax.f32 %v1385_v31, 0.0  ;;  %v1585_v31 = vsel %vm723_vm1, %v3494_v14, -inf }
 0x25b   : > { %v1586_v49 = vrot.slane %v1585_v31, 4 }
 0x25c   : > { %v1442_v5 = vrot.slane %v3534_v44, 1  ;;  %v1445_v23 = vrot.slane %v3534_v44, 4 }
 0x25f   : > { %v3497_v2 = vld [vmem:[#allocation1] sm:$0xff] }
 0x260   : > { %1485 = vst [vmem:[#allocation1] ss:$9 sm:$0xff] %v1392_v33 }
 0x261   : > { %1486 = vst [vmem:[#allocation1 + $0x1] ss:$9 sm:$0xff] %v1426_v47  ;;  %v1560_v47 = vrot.slane %v1559_v35, 2 }
 0x262   : > { %1487 = vst [vmem:[#allocation1 + $0x2] ss:$9 sm:$0xff] %v1427_v36 }
 0x269   : > { %v3499_v57 = vld [vmem:[#allocation1] sm:$0xff] }
 0x26a   : > { %1489 = vst [vmem:[#allocation1] ss:$9 sm:$0xff] %v1393_v38  ;;  %v1566_v38 = vmax.f32 %v1564_v63, %v1565_v26 }
 0x26b   : > { %1490 = vst [vmem:[#allocation1 + $0x1] ss:$9 sm:$0xff] %v1428_v40 }
 0x26c   : > { %1491 = vst [vmem:[#allocation1 + $0x2] ss:$9 sm:$0xff] %v1429_v41  ;;  %v3532_v41 = vpop.f32.mrf.mxu1 }
 0x273   : > { %v1492_v45 = vld [vmem:[#allocation1] sm:$0xff] }
 0x274   : > { %1493 = vst [vmem:[#allocation1] ss:$9 sm:$0xff] %v1430_v24  ;;  %v1606_v43 = vsel %vm723_vm1, %v1492_v45, -inf  ;;  %v1573_v24 = vmax.f32 %v1571_v22, %v1572_v42  ;;  %v1554_v45 = vmax.f32 %v1552_v27, %v1553_v10 }
 0x275   : > { %1494 = vst [vmem:[#allocation1 + $0x1] ss:$9 sm:$0xff] %v1431_v28  ;;  %v1607_v46 = vrot.slane %v1606_v43, 4 }
 0x276   : > { %1495 = vst [vmem:[#allocation1 + $0x2] ss:$9 sm:$0xff] %v1432_v48  ;;  %v1574_v1 = vrot.slane %v1573_v24, 2  ;;  %v1555_v37 = vrot.slane %v1554_v45, 1 }
 0x277   : > { %v1608_v40 = vmax.f32 %v1606_v43, %v1607_v46 }
 0x278   : > { %v1575_v20 = vmax.f32 %v1573_v24, %v1574_v1  ;;  %v3549_v22 = vmax.f32 %v1554_v45, %v1555_v37  ;;  %v1587_v37 = vmax.f32 %v1585_v31, %v1586_v49 }
 0x279   : > { %v1609_v58 = vrot.slane %v1608_v40, 2 }
 0x27b   : > { %v1610_v63 = vmax.f32 %v1608_v40, %v1609_v58 }
 0x27d   : > { %v1496_v53 = vld [vmem:[#allocation1] sm:$0xff]  ;;  %v1611_v26 = vrot.slane %v1610_v63, 1 }
 0x27e   : > { %1497 = vst [vmem:[#allocation1] ss:$9 sm:$0xff] %v1433_v52  ;;  %v1613_v11 = vsel %vm723_vm1, %v1496_v53, -inf  ;;  %v1547_v52 = vmax.f32 %v1545_v51, %v1546_v25 }
 0x27f   : > { %1498 = vst [vmem:[#allocation1 + $0x1] ss:$9 sm:$0xff] %v1434_v32  ;;  %v1614_v8 = vrot.slane %v1613_v11, 4  ;;  %v1561_v32 = vmax.f32 %v1559_v35, %v1560_v47  ;;  %v1612_v40 = vmax.f32 %v1610_v63, %v1611_v26  ;;  %v1386_v63 = vpop.f32.mrf.mxu2 }
 0x280   : > { %1499 = vst [vmem:[#allocation1 + $0x2] ss:$9 sm:$0xff] %v3502_v54 }
 0x281   : > { %v1615_v33 = vmax.f32 %v1613_v11, %v1614_v8  ;;  %v1562_v13 = vrot.slane %v1561_v32, 1 }
 0x283   : > { %v1616_v48 = vrot.slane %v1615_v33, 2  ;;  %v3551_v51 = vmax.f32 %v1561_v32, %v1562_v13 }
 0x285   : > { %v1617_v9 = vmax.f32 %v1615_v33, %v1616_v48  ;;  %v3031_v33 = vld [vmem:[%s3193_s22 + $0x1d0] sm:$0xff] }
 0x286   : > { %2136 = vmatpush.bf16.msra.mxu0 %v3031_v33 }
 0x287   : > { %v1500_v60 = vld [vmem:[#allocation1] sm:$0xff]  ;;  %v1618_v8 = vrot.slane %v1617_v9, 1 }
 0x288   : > { %1501 = vst [vmem:[#allocation1] ss:$9 sm:$0xff] %v1435_v56  ;;  %v1620_v12 = vsel %vm723_vm1, %v1500_v60, -inf  ;;  %v1567_v56 = vrot.slane %v1566_v38, 2  ;;  %v1578_v60 = vsel %vm723_vm1, %v3488_v17, -inf }
 0x289   : > { %1502 = vst [vmem:[#allocation1 + $0x1] ss:$9 sm:$0xff] %v1436_v59  ;;  %v1621_v61 = vrot.slane %v1620_v12, 4  ;;  %v1579_v19 = vrot.slane %v1578_v60, 4  ;;  %v1619_v42 = vmax.f32 %v1617_v9, %v1618_v8 }
 0x28a   : > { %1503 = vst [vmem:[#allocation1 + $0x2] ss:$9 sm:$0xff] %v1437_v62  ;;  %v3013_v62 = vld [vmem:[%s3193_s22 + $0x140] sm:$0xff]  ;;  %v1568_v27 = vmax.f32 %v1566_v38, %v1567_v56 }
 0x28b   : > { %v1622_v30 = vmax.f32 %v1620_v12, %v1621_v61  ;;  %v1548_v12 = vrot.slane %v1547_v52, 1  ;;  %2110 = vmatpush.bf16.msra.mxu3 %v3013_v62  ;;  %v1580_v39 = vmax.f32 %v1578_v60, %v1579_v19  ;;  %v1592_v19 = vsel %vm723_vm1, %v3497_v2, -inf }
 0x28d   : > { %v1623_v53 = vrot.slane %v1622_v30, 2  ;;  %v1549_v7 = vmax.f32 %v1547_v52, %v1548_v12  ;;  %v1683_v52 = vsel %vm880_vm2, %v1619_v42, %v1612_v40 }
 0x28f   : > { %v1624_v15 = vmax.f32 %v1622_v30, %v1623_v53  ;;  %v1581_v30 = vrot.slane %v1580_v39, 2 }
 0x291   : > { %v1504_v16 = vld [vmem:[#allocation1] sm:$0xff]  ;;  %v1625_v35 = vrot.slane %v1624_v15, 1  ;;  %v1582_v58 = vmax.f32 %v1580_v39, %v1581_v30  ;;  %v1448_v39 = vrot.slane %v3534_v44, 7 }
 0x292   : > { %1505 = vst [vmem:[#allocation1] ss:$9 sm:$0xff] %v1438_v55  ;;  %v1627_v18 = vsel %vm723_vm1, %v1504_v16, -inf  ;;  %v1569_v55 = vrot.slane %v1568_v27, 1  ;;  %v1576_v16 = vrot.slane %v1575_v20, 1 }
 0x293   : > { %1506 = vst [vmem:[#allocation1 + $0x1] ss:$9 sm:$0xff] %v1439_v6  ;;  %v1628_v36 = vrot.slane %v1627_v18, 4  ;;  %v3021_v6 = vld [vmem:[%s3193_s22 + $0x180] sm:$0xff]  ;;  %v1583_v12 = vrot.slane %v1582_v58, 1 }
 0x294   : > { %1507 = vst [vmem:[#allocation1 + $0x2] ss:$9 sm:$0xff] %v1440_v29  ;;  %v1679_v29 = vsel %vm880_vm2, %v3549_v22, %v1549_v7  ;;  %2124 = vmatpush.bf16.msra.mxu2 %v3021_v6  ;;  %v3565_v38 = vmax.f32 %v1568_v27, %v1569_v55  ;;  %v3570_v14 = vmax.f32 %v1575_v20, %v1576_v16  ;;  %v3029_v27 = vld [vmem:[%s3193_s22 + $0x1c0] sm:$0xff]  ;;  %v1588_v20 = vrot.slane %v1587_v37, 2 }
 0x295   : > { %v1629_v28 = vmax.f32 %v1627_v18, %v1628_v36  ;;  %v3560_v18 = vmax.f32 %v1624_v15, %v1625_v35  ;;  %v1680_v47 = vsel %vm882_vm3, %v3551_v51, %v1679_v29  ;;  %v1443_v36 = vrot.slane %v3534_v44, 2 }
 0x296   : > { %v1681_v60 = vsel %vm884_vm4, %v3565_v38, %v1680_v47  ;;  %v1358_v15 = vadd.f32 %v3447_v0, %v3532_v41  ;;  %v1447_v41 = vrot.slane %v3534_v44, 6  ;;  %v3608_v8 = vmax.f32 %v1582_v58, %v1583_v12 }
 0x297   : > { %v1630_v59 = vrot.slane %v1629_v28, 2  ;;  %v1684_v56 = vsel %vm882_vm3, %v3560_v18, %v1683_v52  ;;  %v1682_v1 = vsel %vm886_vm5, %v3570_v14, %v1681_v60  ;;  %v1695_v55 = vsel %vm880_vm2, %v3560_v18, %v1619_v42 }
 0x298   : > { %v1387_v7 = vadd.f32 %v1386_v63, %v1358_v15  ;;  %v1589_v6 = vmax.f32 %v1587_v37, %v1588_v20 }
 0x299   : > { %v1631_v17 = vmax.f32 %v1629_v28, %v1630_v59  ;;  %v1444_v28 = vrot.slane %v3534_v44, 3 }
 0x29a   : > { %v1590_v47 = vrot.slane %v1589_v6, 1 }
 0x29b   : > { %v1508_v11 = vld [vmem:[#allocation1] sm:$0xff]  ;;  %v1632_v46 = vrot.slane %v1631_v17, 1 }
 0x29c   : > { %v1634_v43 = vsel %vm723_vm1, %v1508_v11, -inf  ;;  %1509 = vst [vmem:[#allocation1] ss:$9 sm:$0xff] %v1441_v4  ;;  %v3030_v11 = vld [vmem:[%s3193_s22 + $0x1c8] sm:$0xff]  ;;  %v1591_v49 = vmax.f32 %v1589_v6, %v1590_v47 }
 0x29d   : > { %v1635_v21 = vrot.slane %v1634_v43, 4  ;;  %1510 = vst [vmem:[#allocation1 + $0x1] ss:$9 sm:$0xff] %v3534_v44  ;;  %v3547_v54 = vpop.f32.mrf.mxu1  ;;  %v3567_v24 = vmax.f32 %v1631_v17, %v1632_v46  ;;  %2137 = vmatpush.bf16.msra.mxu0 %v3030_v11  ;;  %v3046_v4 = vld [vmem:[%s3435_s15 + $0x48] sm:$0xff] }
 0x29e   : > { %1511 = vst [vmem:[#allocation1 + $0x2] ss:$9 sm:$0xff] %v1442_v5 }
 0x29f   : > { %v1636_v61 = vmax.f32 %v1634_v43, %v1635_v21  ;;  %v1685_v62 = vsel %vm884_vm4, %v3567_v24, %v1684_v56  ;;  %v1691_v43 = vsel %vm880_vm2, %v3551_v51, %v3549_v22  ;;  %v1446_v21 = vrot.slane %v3534_v44, 5 }
 0x2a0   : > { %v1692_v0 = vsel %vm882_vm3, %v3565_v38, %v1691_v43  ;;  %v1696_v46 = vsel %vm882_vm3, %v3567_v24, %v1695_v55  ;;  %v1707_v58 = vsel %vm880_vm2, %v3567_v24, %v3560_v18 }
 0x2a1   : > { %v1637_v10 = vrot.slane %v1636_v61, 2  ;;  %2138 = vmatpush.bf16.msra.mxu0 %v3029_v27  ;;  %v1693_v16 = vsel %vm884_vm4, %v3570_v14, %v1692_v0 }
 0x2a3   : > { %v1638_v25 = vmax.f32 %v1636_v61, %v1637_v10  ;;  %v1593_v61 = vrot.slane %v1592_v19, 4  ;;  %v1694_v10 = vsel %vm886_vm5, %v3608_v8, %v1693_v16 }
 0x2a5   : > { %v1639_v45 = vrot.slane %v1638_v25, 1  ;;  %v1512_v48 = vld [vmem:[#allocation1] sm:$0xff]  ;;  %v2314_v50 = vpop.f32.mrf.mxu1  ;;  %v1594_v31 = vmax.f32 %v1592_v19, %v1593_v61 }
 0x2a6   : > { %v1641_v32 = vsel %vm723_vm1, %v1512_v48, -inf  ;;  %1513 = vst [vmem:[#allocation1] ss:$9 sm:$0xff] %v1443_v36  ;;  %v1599_v36 = vsel %vm723_vm1, %v3499_v57, -inf }
 0x2a7   : > { %v3575_v53 = vmax.f32 %v1638_v25, %v1639_v45  ;;  %v1642_v59 = vrot.slane %v1641_v32, 4  ;;  %1514 = vst [vmem:[#allocation1 + $0x1] ss:$9 sm:$0xff] %v1444_v28  ;;  %v1396_v25 = vmax.f32 %v1387_v7, 0.0  ;;  %v1595_v28 = vrot.slane %v1594_v31, 2 }
 0x2a8   : > { %1515 = vst [vmem:[#allocation1 + $0x2] ss:$9 sm:$0xff] %v1445_v23  ;;  %v1703_v45 = vsel %vm880_vm2, %v3565_v38, %v3551_v51  ;;  %v1600_v52 = vrot.slane %v1599_v36, 4 }
 0x2a9   : > { %v1686_v3 = vsel %vm886_vm5, %v3575_v53, %v1685_v62  ;;  %v1643_v5 = vmax.f32 %v1641_v32, %v1642_v59  ;;  %v1697_v44 = vsel %vm884_vm4, %v3575_v53, %v1696_v46  ;;  %v1449_v48 = vrot.slane %v1396_v25, 1 }
 0x2aa   : > { %v2860_v9 = vpack.c.bf16 %v1686_v3, %v1682_v1  ;;  %v1450_v32 = vrot.slane %v1396_v25, 2  ;;  %v1704_v56 = vsel %vm882_vm3, %v3570_v14, %v1703_v45  ;;  %v1708_v51 = vsel %vm882_vm3, %v3575_v53, %v1707_v58  ;;  %v3045_v58 = vld [vmem:[%s3435_s15 + $0x40] sm:$0xff] }
 0x2ab   : > { %v1644_v13 = vrot.slane %v1643_v5, 2  ;;  %v1596_v60 = vmax.f32 %v1594_v31, %v1595_v28  ;;  %v1705_v1 = vsel %vm884_vm4, %v3608_v8, %v1704_v56  ;;  %v3049_v28 = vld [vmem:[%s3435_s15 + $0x60] sm:$0xff] }
 0x2ac   : > { %2861 = vmatmul.msk.bf16.vlgmr.msrb.gmra.mxu3 %vm3589_vm11, %v2860_v9  ;;  %v1601_v9 = vmax.f32 %v1599_v36, %v1600_v52 }
 0x2ad   : > { %v1645_v17 = vmax.f32 %v1643_v5, %v1644_v13  ;;  %v1706_v5 = vsel %vm886_vm5, %v1591_v49, %v1705_v1  ;;  %v1597_v12 = vrot.slane %v1596_v60, 1 }
 0x2ae   : > { %v1602_v19 = vrot.slane %v1601_v9, 2 }
 0x2af   : > { %v1646_v35 = vrot.slane %v1645_v17, 1  ;;  %v1516_v2 = vld [vmem:[#allocation1] sm:$0xff]  ;;  %v1598_v27 = vmax.f32 %v1596_v60, %v1597_v12 }
 0x2b0   : > { %v1648_v22 = vsel %vm723_vm1, %v1516_v2, -inf  ;;  %1517 = vst [vmem:[#allocation1] ss:$9 sm:$0xff] %v1446_v21  ;;  %v1719_v21 = vsel %vm880_vm2, %v3575_v53, %v3567_v24  ;;  %v1603_v2 = vmax.f32 %v1601_v9, %v1602_v19 }
 0x2b1   : > { %v3614_v26 = vmax.f32 %v1645_v17, %v1646_v35  ;;  %v1649_v34 = vrot.slane %v1648_v22, 4  ;;  %1518 = vst [vmem:[#allocation1 + $0x1] ss:$9 sm:$0xff] %v1447_v41  ;;  %v1715_v17 = vsel %vm880_vm2, %v3570_v14, %v3565_v38 }
 0x2b2   : > { %1519 = vst [vmem:[#allocation1 + $0x2] ss:$9 sm:$0xff] %v1448_v39  ;;  %v1716_v20 = vsel %vm882_vm3, %v3608_v8, %v1715_v17  ;;  %v1604_v6 = vrot.slane %v1603_v2, 1 }
 0x2b3   : > { %v1698_v42 = vsel %vm886_vm5, %v3614_v26, %v1697_v44  ;;  %v1650_v29 = vmax.f32 %v1648_v22, %v1649_v34  ;;  %v1709_v3 = vsel %vm884_vm4, %v3614_v26, %v1708_v51  ;;  %v1720_v35 = vsel %vm882_vm3, %v3614_v26, %v1719_v21 }
 0x2b4   : > { %v2863_v33 = vpack.c.bf16 %v1698_v42, %v1694_v10  ;;  %v1717_v39 = vsel %vm884_vm4, %v1591_v49, %v1716_v20  ;;  %v1605_v16 = vmax.f32 %v1603_v2, %v1604_v6  ;;  %v1727_v10 = vsel %vm880_vm2, %v3608_v8, %v3570_v14 }
 0x2b5   : > { %v1651_v30 = vrot.slane %v1650_v29, 2  ;;  %v1718_v7 = vsel %vm886_vm5, %v1598_v27, %v1717_v39  ;;  %v1731_v42 = vsel %vm880_vm2, %v3614_v26, %v3575_v53  ;;  %v1728_v31 = vsel %vm882_vm3, %v1591_v49, %v1727_v10  ;;  %v3052_v53 = vld [vmem:[%s3435_s15 + $0x78] sm:$0xff]  ;;  %v3051_v26 = vld [vmem:[%s3435_s15 + $0x70] sm:$0xff] }
 0x2b6   : > { %2864 = vmatmul.msk.bf16.vlgmr.msrb.gmra.mxu0 %vm3589_vm11, %v2863_v33  ;;  %2316 = vmatpush.bf16.msrb.mxu3 %v3052_v53 }
 0x2b7   : > { %v1652_v40 = vmax.f32 %v1650_v29, %v1651_v30 }
 0x2b9   : > { %v1653_v50 = vrot.slane %v1652_v40, 1  ;;  %v1520_v23 = vld [vmem:[#allocation1] sm:$0xff] }
 0x2ba   : > { %v1655_v57 = vsel %vm723_vm1, %v1520_v23, -inf  ;;  %1521 = vst [vmem:[#allocation1] ss:$9 sm:$0xff] %v1396_v25  ;;  %v1729_v25 = vsel %vm884_vm4, %v1598_v27, %v1728_v31  ;;  %2317 = vmatpush.bf16.msrb.mxu3 %v3051_v26  ;;  %v3065_v23 = vld [vmem:[%s3200_s25 + $0x1] ss:$0 sm:$0xff] }
 0x2bb   : > { %v1654_v59 = vmax.f32 %v1652_v40, %v1653_v50  ;;  %v1656_v62 = vrot.slane %v1655_v57, 4  ;;  %1522 = vst [vmem:[#allocation1 + $0x1] ss:$9 sm:$0xff] %v1449_v48  ;;  %v1730_v30 = vsel %vm886_vm5, %v1605_v16, %v1729_v25  ;;  %v3050_v40 = vld [vmem:[%s3435_s15 + $0x68] sm:$0xff]  ;;  %v3048_v48 = vld [vmem:[%s3435_s15 + $0x58] sm:$0xff]  ;;  %v3047_v50 = vld [vmem:[%s3435_s15 + $0x50] sm:$0xff] }
 0x2bc   : > { %1523 = vst [vmem:[#allocation1 + $0x2] ss:$9 sm:$0xff] %v1450_v32 }
 0x2bd   : > { %v1710_v18 = vsel %vm886_vm5, %v1654_v59, %v1709_v3  ;;  %v1657_v37 = vmax.f32 %v1655_v57, %v1656_v62  ;;  %v1721_v38 = vsel %vm884_vm4, %v1654_v59, %v1720_v35  ;;  %v1732_v33 = vsel %vm882_vm3, %v1654_v59, %v1731_v42 }
 0x2be   : > { %v2866_v11 = vpack.c.bf16 %v1710_v18, %v1706_v5  ;;  %2318 = vmatpush.bf16.msrb.mxu3 %v3050_v40 }
 0x2bf   : > { %v1658_v13 = vrot.slane %v1657_v37, 2 }
 0x2c0   : > { %2867 = vmatmul.msk.bf16.vlgmr.msra.gmra.mxu3 %vm3589_vm11, %v2866_v11 }
 0x2c1   : > { %v1659_v15 = vmax.f32 %v1657_v37, %v1658_v13 }
 0x2c2   : > { %2319 = vmatpush.bf16.msrb.mxu3 %v3049_v28 }
 0x2c3   : > { %v1660_v63 = vrot.slane %v1659_v15, 1  ;;  %v1524_v43 = vld [vmem:[#allocation1] sm:$0xff] }
 0x2c4   : > { %v1662_v0 = vsel %vm723_vm1, %v1524_v43, -inf }
 0x2c5   : > { %v1661_v41 = vmax.f32 %v1659_v15, %v1660_v63  ;;  %v1663_v61 = vrot.slane %v1662_v0, 4 }
 0x2c6   : > { %2320 = vmatpush.bf16.msrb.mxu3 %v3048_v48 }
 0x2c7   : > { %v1722_v55 = vsel %vm886_vm5, %v1661_v41, %v1721_v38  ;;  %v1664_v22 = vmax.f32 %v1662_v0, %v1663_v61  ;;  %v1733_v47 = vsel %vm884_vm4, %v1661_v41, %v1732_v33 }
 0x2c8   : > { %v2869_v46 = vpack.c.bf16 %v1722_v55, %v1718_v7 }
 0x2c9   : > { %v1665_v24 = vrot.slane %v1664_v22, 2 }
 0x2ca   : > { %2870 = vmatmul.msk.bf16.vlgmr.msra.gmra.mxu2 %vm3589_vm11, %v2869_v46  ;;  %2321 = vmatpush.bf16.msrb.mxu3 %v3047_v50  ;;  %v3064_v46 = vld [vmem:[%s427_s16] ss:$0 sm:$0xff] }
 0x2cb   : > { %v1666_v34 = vmax.f32 %v1664_v22, %v1665_v24  ;;  %v2313_v6 = vadd.f32 %v3064_v46, %v3547_v54 }
 0x2cd   : > { %v1667_v44 = vrot.slane %v1666_v34, 1 }
 0x2ce   : > { %2322 = vmatpush.bf16.msrb.mxu3 %v3046_v4 }
 0x2cf   : > { %v1668_v29 = vmax.f32 %v1666_v34, %v1667_v44 }
 0x2d1   : > { %v1734_v14 = vsel %vm886_vm5, %v1668_v29, %v1733_v47 }
 0x2d2   : > { %v2872_v8 = vpack.c.bf16 %v1734_v14, %v1730_v30  ;;  %2323 = vmatpush.bf16.msrb.mxu3 %v3045_v58 }
 0x2d4   : > { %2873 = vmatmul.msk.bf16.vlgmr.msra.gmra.mxu0 %vm3589_vm11, %v2872_v8 }
 0x32f   : > { %v2084_v36 = vpop.f32.mrf.mxu3 }
 0x330   : > { %v2085_v52 = vadd.f32 %v3065_v23, %v2084_v36 }
 0x333   : > { %v2098_v49 = vpop.f32.mrf.mxu0 }
 0x334   : > { %v2099_v57 = vadd.f32 %v2098_v49, %v2085_v52 }
 0x337   : > { %v2086_v45 = vpop.f32.mrf.mxu3 }
 0x338   : > { %v2087_v60 = vadd.f32 %v3065_v23, %v2086_v45 }
 0x33b   : > { %v2100_v56 = vpop.f32.mrf.mxu0 }
 0x33c   : > { %v2101_v5 = vadd.f32 %v2100_v56, %v2087_v60 }
 0x343   : > { %v2112_v32 = vpop.f32.mrf.mxu3 }
 0x344   : > { %v2113_v59 = vadd.f32 %v2112_v32, %v2099_v57 }
 0x34b   : > { %v2114_v1 = vpop.f32.mrf.mxu3 }
 0x34c   : > { %v2115_v37 = vadd.f32 %v2114_v1, %v2101_v5 }
 0x34d   : > { %v2126_v51 = vpop.f32.mrf.mxu2 }
 0x34e   : > { %v2127_v62 = vadd.f32 %v2126_v51, %v2113_v59 }
 0x351   : > { %v2140_v3 = vpop.f32.mrf.mxu0 }
 0x352   : > { %v2141_v18 = vadd.f32 %v2140_v3, %v2127_v62 }
 0x354   : > { %v2145_v9 = vmax.f32 %v2141_v18, 0.0 }
 0x355   : > { %v2128_v11 = vpop.f32.mrf.mxu2 }
 0x356   : > { %v2147_v12 = vsel %vm1737_vm10, %v2145_v9, -inf  ;;  %v2129_v13 = vadd.f32 %v2128_v11, %v2115_v37 }
 0x357   : > { %v2148_v15 = vrot.slane %v2147_v12, 4 }
 0x359   : > { %v2149_v19 = vmax.f32 %v2147_v12, %v2148_v15  ;;  %v2142_v27 = vpop.f32.mrf.mxu0 }
 0x35a   : > { %v2143_v63 = vadd.f32 %v2142_v27, %v2129_v13 }
 0x35b   : > { %v2150_v43 = vrot.slane %v2149_v19, 2 }
 0x35c   : > { %v2146_v17 = vmax.f32 %v2143_v63, 0.0 }
 0x35d   : > { %v2151_v0 = vmax.f32 %v2149_v19, %v2150_v43 }
 0x35e   : > { %v2154_v20 = vsel %vm1737_vm10, %v2146_v17, -inf }
 0x35f   : > { %v2155_v21 = vrot.slane %v2154_v20, 4  ;;  %v2152_v2 = vrot.slane %v2151_v0, 1 }
 0x361   : > { %v2156_v41 = vmax.f32 %v2154_v20, %v2155_v21  ;;  %v2153_v38 = vmax.f32 %v2151_v0, %v2152_v2 }
 0x363   : > { %v2157_v35 = vrot.slane %v2156_v41, 2 }
 0x365   : > { %v2158_v61 = vmax.f32 %v2156_v41, %v2157_v35 }
 0x367   : > { %v2159_v39 = vrot.slane %v2158_v61, 1 }
 0x369   : > { %v2160_v7 = vmax.f32 %v2158_v61, %v2159_v39 }
 0x36b   : > { %v2167_v55 = vsel %vm880_vm2, %v2160_v7, %v2153_v38 }
 0x36c   : > { %v2170_v22 = vpack.c.bf16 %v2167_v55, %v2167_v55 }
 0x36e   : > { %2324 = vmatmul.bf16.vlgmr.msrb.gmra.mxu3 %v2170_v22 }
 0x3f1   : > { %v2325_v24 = vpop.f32.mrf.mxu3 }
 0x3f2   : > { %v2326_v34 = vadd.f32 %v2325_v24, %v2313_v6 }
 0x3f4   : > { %v2329_v16 = vmax.f32 %v2326_v34, 0.0 }
 0x3f6   : > { %2330 = vst [vmem:[%s431_s21] sm:$0x3] %v2329_v16 }
 0x3f9   : > { %v2327_v44 = vpop.f32.mrf.mxu3 }
 0x3fa PF: > { %s18_s27 = sadd.s32 1, %s3072_s27  }
 0x3fb   : > { %p15_p4 = scmp.ge.s32.totalorder %s18_s27, 4  }
 0x3fd   :  { %17 = sbr.rel (!%p15_p4) target bundleno = 1 (0x1), region = 107 }

</bundles_post_ra>
